<compile_context>
chip_gen: v6e
topology: v6e:2x2x1
jax: 0.10.0
libtpu: 0.0.40
codegen_flags: <defaults>
</compile_context>

<pallas_src>
import functools

import jax
import jax.numpy as jnp
from jax import lax
from jax.experimental import pallas as pl
from jax.experimental.pallas import tpu as pltpu


# ----------------------------------------------------------------------------
# Pallas kernel: score all hypotheses for `bt` batch elements per grid step.
# ----------------------------------------------------------------------------
def _dsac_score_kernel(cx_ref, cy_ref, img1_ref, p2_ref, scores_ref,
                       *, Hp, Wp, num_hyp, bt):
    N = Hp * Wp
    NH = num_hyp * N

    # Output-pixel integer coordinates generated in-kernel (no coords input).
    # Float trick avoids vector integer div/mod.
    lane = lax.broadcasted_iota(jnp.int32, (1, N), 1).astype(jnp.float32)
    oi = jnp.floor((lane + 0.5) * (1.0 / Wp))          # output row index
    oj = lane - oi * Wp                                # output col index

    # Constant source-pixel index columns; built/broadcast once per step
    # (hoisted out of the batch & hypothesis loops).
    col = lax.broadcasted_iota(jnp.int32, (Wp, 1), 0).astype(jnp.float32)
    row = lax.broadcasted_iota(jnp.int32, (Hp, 1), 0).astype(jnp.float32)
    col_b = jnp.broadcast_to(col, (Wp, NH))
    row_b = jnp.broadcast_to(row, (Hp, NH))

    inv_n = jnp.float32(1.0 / N)
    step = pl.program_id(0)

    score_blocks = []
    # bt <= ceil(B/2) is tiny, so a static Python loop over batch is fine.
    for b in range(bt):
        gb = step * bt + b                   # row into the SMEM coef tables
        img1 = img1_ref[b]                   # (Hp, Wp)
        p2 = p2_ref[b]                       # (1, N)

        # Source-pixel coords for ALL hypotheses, lane-segmented: segment h of
        # px_flat holds hypothesis h's N coordinates.  Coefficients are SMEM
        # scalars -> pure scalar-operand VPU ops, no lane-sparse VMEM slices.
        px_parts, py_parts = [], []
        for h in range(num_hyp):
            cx0 = cx_ref[gb, 3 * h + 0]
            cx1 = cx_ref[gb, 3 * h + 1]
            cx2 = cx_ref[gb, 3 * h + 2]
            cy0 = cy_ref[gb, 3 * h + 0]
            cy1 = cy_ref[gb, 3 * h + 1]
            cy2 = cy_ref[gb, 3 * h + 2]
            px_parts.append(cx0 * oj + cx1 * oi + cx2)       # (1, N)
            py_parts.append(cy0 * oj + cy1 * oi + cy2)       # (1, N)
        px_flat = jnp.concatenate(px_parts, axis=1)          # (1, NH)
        py_flat = jnp.concatenate(py_parts, axis=1)          # (1, NH)

        # Separable bilinear weights (== grid_sample, zeros padding,
        # align_corners=True) for every hypothesis at once.
        kx_all = jnp.maximum(0.0, 1.0 - jnp.abs(px_flat - col_b))   # (Wp, NH)
        ky_all = jnp.maximum(0.0, 1.0 - jnp.abs(py_flat - row_b))   # (Hp, NH)

        # X direction: ONE wide MXU matmul for all hypotheses.
        tmp = jnp.dot(img1, kx_all,
                      preferred_element_type=jnp.float32)           # (Hp, NH)
        # Y direction: elementwise weight + a single sublane reduce.
        warped_flat = jnp.sum(ky_all * tmp, axis=0, keepdims=True)  # (1, NH)

        # Put hypotheses back on sublanes via static lane-tile-aligned slices
        # so one jnp.sum(axis=1) yields every hypothesis' score (no
        # where()-select chain / loop-carried dependence).
        warped = jnp.concatenate(
            [warped_flat[:, h * N:(h + 1) * N] for h in range(num_hyp)],
            axis=0)                                                 # (nh, N)
        diff = jnp.abs(warped - p2)                                 # (nh, N)
        score_blocks.append(
            -inv_n * jnp.sum(diff, axis=1, keepdims=True))          # (nh, 1)

    # Single store of the whole (bt, num_hyp, 1) output block per grid step.
    scores_ref[...] = jnp.stack(score_blocks, axis=0)


def score_hypotheses_pallas(patch_pairs, hypotheses, *, max_steps=2):
    """patch_pairs: (B, 2, Hp, Wp) f32, hypotheses: (B, nh, 3, 3) f32
       returns scores: (B, nh) f32."""
    B, _, Hp, Wp = patch_pairs.shape
    num_hyp = hypotheses.shape[1]
    N = Hp * Wp
    assert Hp > 1 and Wp > 1, "patches must be >= 2x2 (affine_grid norm)"

    # At most `max_steps` grid steps: >= 2 steps keeps both v7x TensorCores
    # busy for B >= 2, while fusing ceil(B/steps) batch elements per step
    # amortizes the per-grid-step overhead on single-TC v5e/v6e.
    # TODO(synk): for B == 1 on v7x, a second "parallel" axis over hypothesis
    # chunks would keep both TensorCores busy.
    num_steps = min(B, max_steps)
    bt = -(-B // num_steps)                  # ceil(B / num_steps)
    Bp = num_steps * bt

    img1 = patch_pairs[:, 0].astype(jnp.float32)                    # (B,Hp,Wp)
    p2 = patch_pairs[:, 1].reshape(B, 1, N).astype(jnp.float32)     # (B,1,N)

    # theta = H[:2, :3].  Fold affine_grid normalization (align_corners=True)
    # and the (g+1)*0.5*(dim-1) pixel scaling into coefficients on integer
    # output coords (oj, oi, 1):  px = cx0*oj + cx1*oi + cx2, same for py.
    Hr = hypotheses[:, :, :2, :3].astype(jnp.float32)                # (B,nh,2,3)
    t00, t01, t02 = Hr[..., 0, 0], Hr[..., 0, 1], Hr[..., 0, 2]
    t10, t11, t12 = Hr[..., 1, 0], Hr[..., 1, 1], Hr[..., 1, 2]
    sW = (Wp - 1) * 0.5
    sH = (Hp - 1) * 0.5
    cx = jnp.stack([t00,
                    t01 * ((Wp - 1.0) / (Hp - 1.0)),
                    sW * (t02 + 1.0 - t00 - t01)], axis=-1)          # (B,nh,3)
    cy = jnp.stack([t10 * ((Hp - 1.0) / (Wp - 1.0)),
                    t11,
                    sH * (t12 + 1.0 - t10 - t11)], axis=-1)          # (B,nh,3)
    cx2d = cx.reshape(B, num_hyp * 3)      # SMEM coefficient tables
    cy2d = cy.reshape(B, num_hyp * 3)

    if Bp != B:                            # pad batch so the grid tiles evenly
        pad = Bp - B
        img1 = jnp.pad(img1, ((0, pad), (0, 0), (0, 0)))
        p2 = jnp.pad(p2, ((0, pad), (0, 0), (0, 0)))
        cx2d = jnp.pad(cx2d, ((0, pad), (0, 0)))
        cy2d = jnp.pad(cy2d, ((0, pad), (0, 0)))

    kernel = functools.partial(_dsac_score_kernel, Hp=Hp, Wp=Wp,
                               num_hyp=num_hyp, bt=bt)

    # NOTE: the batched (Wp, num_hyp*N)/(Hp, num_hyp*N) weight slabs scale with
    # num_hyp*N; for much larger patches / hypothesis counts, chunk the
    # hypothesis axis (extra grid dim) to stay inside VMEM (esp. v7x 64 MiB).
    out = pl.pallas_call(
        kernel,
        out_shape=jax.ShapeDtypeStruct((Bp, num_hyp, 1), jnp.float32),
        grid=(num_steps,),
        in_specs=[
            pl.BlockSpec(memory_space=pltpu.MemorySpace.SMEM),       # cx table
            pl.BlockSpec(memory_space=pltpu.MemorySpace.SMEM),       # cy table
            pl.BlockSpec((bt, Hp, Wp), lambda i: (i, 0, 0)),         # patch1
            pl.BlockSpec((bt, 1, N), lambda i: (i, 0, 0)),           # patch2
        ],
        out_specs=pl.BlockSpec((bt, num_hyp, 1), lambda i: (i, 0, 0)),
        compiler_params=pltpu.CompilerParams(
            dimension_semantics=("parallel",)),
    )(cx2d, cy2d, img1, p2)
    return out[:B, :, 0]


# ----------------------------------------------------------------------------
# Hypothesis generation (glue, plain JAX) — mirrors the torch module
# ----------------------------------------------------------------------------
def generate_hypotheses(key, batch_size, num_hypotheses, patch_size):
    base = jnp.array(
        [[0, 0], [patch_size, 0], [patch_size, patch_size],
         [0, patch_size], [patch_size // 2, patch_size // 2]], jnp.float32)
    total = batch_size * num_hypotheses
    k_perm, k_noise = jax.random.split(key)

    # randperm(5)[:4] per hypothesis, via argsort of uniforms.
    order = jnp.argsort(jax.random.uniform(k_perm, (total, 5)), axis=1)[:, :4]
    src = base[order]                                              # (total,4,2)
    noise = jax.random.normal(k_noise, (total, 4, 2), jnp.float32) * 8.0
    dst = src + noise

    x, y = src[..., 0], src[..., 1]
    u, v = dst[..., 0], dst[..., 1]
    z = jnp.zeros_like(x)
    o = jnp.ones_like(x)
    rows1 = jnp.stack([x, y, o, z, z, z, -u * x, -u * y, -u], axis=-1)
    rows2 = jnp.stack([z, z, z, x, y, o, -v * x, -v * y, -v], axis=-1)
    A = jnp.concatenate([rows1, rows2], axis=1)                    # (total,8,9)

    # torch.svd(A) with some=True returns V (9, 8); V[:, -1] is the singular
    # vector of the smallest *returned* singular value -> last row of the
    # reduced Vh (parity with the PyTorch layer, not an exact null space).
    _, _, Vh = jnp.linalg.svd(A, full_matrices=False)              # (total,8,9)
    Hm = Vh[:, -1, :].reshape(total, 3, 3)
    # Mirrors the torch module: normalized once in compute_homography and once
    # more in generate_hypotheses.
    Hm = Hm / (Hm[:, 2:3, 2:3] + 1e-8)
    Hm = Hm / (Hm[:, 2:3, 2:3] + 1e-8)
    return Hm.reshape(batch_size, num_hypotheses, 3, 3)


def dsac_patch_forward(patch_pairs, key, *, patch_size, num_hypotheses):
    """Eval-mode forward: returns (selected_H (B,3,3), probabilities (B,nh))."""
    B = patch_pairs.shape[0]
    hyps = generate_hypotheses(key, B, num_hypotheses, patch_size)
    scores = score_hypotheses_pallas(patch_pairs, hyps)
    probabilities = jax.nn.softmax(scores, axis=1)
    # TODO(synk): training-mode branch uses torch.multinomial sampling; only
    # the deterministic eval/argmax branch is implemented here.
    selected_idx = jnp.argmax(probabilities, axis=1)
    selected_H = hyps[jnp.arange(B), selected_idx]
    return selected_H, probabilities


# ----------------------------------------------------------------------------
# Pure-JAX reference of the scoring path (grid_sample via gather) for checking
# ----------------------------------------------------------------------------
def _score_ref(patch_pairs, hypotheses):
    B, _, Hp, Wp = patch_pairs.shape
    nh = hypotheses.shape[1]
    jj, ii = jnp.meshgrid(jnp.arange(Wp), jnp.arange(Hp))
    Xn = (2.0 * jj / (Wp - 1) - 1.0).reshape(-1)
    Yn = (2.0 * ii / (Hp - 1) - 1.0).reshape(-1)

    def sample(img, px, py):
        x0 = jnp.floor(px); y0 = jnp.floor(py)
        x1 = x0 + 1.0; y1 = y0 + 1.0
        wx1 = px - x0; wx0 = 1.0 - wx1
        wy1 = py - y0; wy0 = 1.0 - wy1

        def get(yy, xx):
            valid = (xx >= 0) & (xx <= Wp - 1) & (yy >= 0) & (yy <= Hp - 1)
            xi = jnp.clip(xx, 0, Wp - 1).astype(jnp.int32)
            yi = jnp.clip(yy, 0, Hp - 1).astype(jnp.int32)
            return jnp.where(valid, img[yi, xi], 0.0)

        return (wy0 * wx0 * get(y0, x0) + wy0 * wx1 * get(y0, x1)
                + wy1 * wx0 * get(y1, x0) + wy1 * wx1 * get(y1, x1))

    out = []
    for b in range(B):
        p1 = patch_pairs[b, 0]
        p2 = patch_pairs[b, 1].reshape(-1)
        row = []
        for h in range(nh):
            t = hypotheses[b, h, :2, :3]
            gx = t[0, 0] * Xn + t[0, 1] * Yn + t[0, 2]
            gy = t[1, 0] * Xn + t[1, 1] * Yn + t[1, 2]
            px = (gx + 1.0) * 0.5 * (Wp - 1)
            py = (gy + 1.0) * 0.5 * (Hp - 1)
            warped = sample(p1, px, py)
            row.append(-jnp.mean(jnp.abs(warped - p2)))
        out.append(jnp.stack(row))
    return jnp.stack(out)


if __name__ == "__main__":
    B, Hp, Wp = 2, 16, 16
    patch_size = 16
    num_hypotheses = 8

    key = jax.random.PRNGKey(0)
    k_in, k_hyp = jax.random.split(key)
    patch_pairs = jax.random.uniform(k_in, (B, 2, Hp, Wp), jnp.float32)

    # Full forward (eval mode).
    selected_H, probabilities = dsac_patch_forward(
        patch_pairs, k_hyp, patch_size=patch_size,
        num_hypotheses=num_hypotheses)
    jax.block_until_ready((selected_H, probabilities))
    assert selected_H.shape == (B, 3, 3)
    assert probabilities.shape == (B, num_hypotheses)

    # Correctness check of the Pallas scoring kernel against a pure-JAX ref
    # with identical hypotheses.  The separable/dense bilinear forms are
    # mathematically exact; remaining error is f32 rounding from folding the
    # pixel scaling into the coefficients, so a few 1e-4 is expected.
    hyps = generate_hypotheses(k_hyp, B, num_hypotheses, patch_size)
    scores_kernel = jax.block_until_ready(
        score_hypotheses_pallas(patch_pairs, hyps))
    scores_ref = jax.block_until_ready(_score_ref(patch_pairs, hyps))
    max_err = float(jnp.max(jnp.abs(scores_kernel - scores_ref)))
    assert max_err < 2e-3, f"kernel/ref mismatch: {max_err}"

    print("KERNEL_OK")
</pallas_src>

<mosaic_0001>
module attributes {stable_mosaic.version = 11 : i64} {
  func.func @_dsac_score_kernel(%arg0: i32, %arg1: memref<2x24xf32, #tpu.memory_space<smem>>, %arg2: memref<2x24xf32, #tpu.memory_space<smem>>, %arg3: memref<1x16x16xf32, #tpu.memory_space<vmem>>, %arg4: memref<1x1x256xf32, #tpu.memory_space<vmem>>, %arg5: memref<1x8x1xf32, #tpu.memory_space<vmem>>) attributes {dimension_semantics = [#tpu.dimension_semantics<parallel>], iteration_bounds = array<i64: 2>, scalar_prefetch = 0 : i64, scratch_operands = 0 : i64, tpu.core_type = #tpu.core_type<tc>, window_params = [{transform_indices = @transform_0, window_bounds = array<i64: 2, 24>}, {transform_indices = @transform_1, window_bounds = array<i64: 2, 24>}, {transform_indices = @transform_2, window_bounds = array<i64: 1, 16, 16>}, {transform_indices = @transform_3, window_bounds = array<i64: 1, 1, 256>}, {transform_indices = @transform_4, window_bounds = array<i64: 1, 8, 1>}]} {
    %0 = tpu.iota {dimensions = array<i32: 1>} : vector<1x256xi32>
    %1 = arith.sitofp %0 : vector<1x256xi32> to vector<1x256xf32>
    %cst = arith.constant 5.000000e-01 : f32
    %2 = vector.broadcast %cst : f32 to vector<1x256xf32>
    %3 = arith.addf %1, %2 : vector<1x256xf32>
    %cst_0 = arith.constant 6.250000e-02 : f32
    %4 = vector.broadcast %cst_0 : f32 to vector<1x256xf32>
    %5 = arith.mulf %3, %4 : vector<1x256xf32>
    %6 = math.floor %5 : vector<1x256xf32>
    %cst_1 = arith.constant 1.600000e+01 : f32
    %7 = vector.broadcast %cst_1 : f32 to vector<1x256xf32>
    %8 = arith.mulf %6, %7 : vector<1x256xf32>
    %9 = arith.subf %1, %8 : vector<1x256xf32>
    %10 = tpu.iota {dimensions = array<i32: 0>} : vector<16x1xi32>
    %11 = arith.sitofp %10 : vector<16x1xi32> to vector<16x1xf32>
    %12 = tpu.iota {dimensions = array<i32: 0>} : vector<16x1xi32>
    %13 = arith.sitofp %12 : vector<16x1xi32> to vector<16x1xf32>
    %14 = vector.shape_cast %11 : vector<16x1xf32> to vector<16x1xf32>
    %15 = vector.broadcast %14 : vector<16x1xf32> to vector<16x2048xf32>
    %16 = vector.shape_cast %13 : vector<16x1xf32> to vector<16x1xf32>
    %17 = vector.broadcast %16 : vector<16x1xf32> to vector<16x2048xf32>
    %c1_i32 = arith.constant 1 : i32
    %18 = arith.muli %arg0, %c1_i32 : i32
    %c0_i32 = arith.constant 0 : i32
    %19 = arith.addi %18, %c0_i32 : i32
    %c0 = arith.constant 0 : index
    %c0_2 = arith.constant 0 : index
    %c0_3 = arith.constant 0 : index
    %20 = vector.load %arg3[%c0, %c0_2, %c0_3] : memref<1x16x16xf32, #tpu.memory_space<vmem>>, vector<1x16x16xf32>
    %21 = vector.shape_cast %20 : vector<1x16x16xf32> to vector<16x16xf32>
    %c0_4 = arith.constant 0 : index
    %c0_5 = arith.constant 0 : index
    %c0_6 = arith.constant 0 : index
    %22 = vector.load %arg4[%c0_4, %c0_5, %c0_6] : memref<1x1x256xf32, #tpu.memory_space<vmem>>, vector<1x1x256xf32>
    %23 = vector.shape_cast %22 : vector<1x1x256xf32> to vector<1x256xf32>
    %24 = arith.index_cast %19 : i32 to index
    %c0_7 = arith.constant 0 : index
    %25 = memref.load %arg1[%24, %c0_7] : memref<2x24xf32, #tpu.memory_space<smem>>
    %26 = arith.index_cast %19 : i32 to index
    %c1 = arith.constant 1 : index
    %27 = memref.load %arg1[%26, %c1] : memref<2x24xf32, #tpu.memory_space<smem>>
    %28 = arith.index_cast %19 : i32 to index
    %c2 = arith.constant 2 : index
    %29 = memref.load %arg1[%28, %c2] : memref<2x24xf32, #tpu.memory_space<smem>>
    %30 = arith.index_cast %19 : i32 to index
    %c0_8 = arith.constant 0 : index
    %31 = memref.load %arg2[%30, %c0_8] : memref<2x24xf32, #tpu.memory_space<smem>>
    %32 = arith.index_cast %19 : i32 to index
    %c1_9 = arith.constant 1 : index
    %33 = memref.load %arg2[%32, %c1_9] : memref<2x24xf32, #tpu.memory_space<smem>>
    %34 = arith.index_cast %19 : i32 to index
    %c2_10 = arith.constant 2 : index
    %35 = memref.load %arg2[%34, %c2_10] : memref<2x24xf32, #tpu.memory_space<smem>>
    %36 = vector.broadcast %25 : f32 to vector<1x256xf32>
    %37 = arith.mulf %36, %9 : vector<1x256xf32>
    %38 = vector.broadcast %27 : f32 to vector<1x256xf32>
    %39 = arith.mulf %38, %6 : vector<1x256xf32>
    %40 = arith.addf %37, %39 : vector<1x256xf32>
    %41 = vector.broadcast %29 : f32 to vector<1x256xf32>
    %42 = arith.addf %40, %41 : vector<1x256xf32>
    %43 = vector.broadcast %31 : f32 to vector<1x256xf32>
    %44 = arith.mulf %43, %9 : vector<1x256xf32>
    %45 = vector.broadcast %33 : f32 to vector<1x256xf32>
    %46 = arith.mulf %45, %6 : vector<1x256xf32>
    %47 = arith.addf %44, %46 : vector<1x256xf32>
    %48 = vector.broadcast %35 : f32 to vector<1x256xf32>
    %49 = arith.addf %47, %48 : vector<1x256xf32>
    %50 = arith.index_cast %19 : i32 to index
    %c3 = arith.constant 3 : index
    %51 = memref.load %arg1[%50, %c3] : memref<2x24xf32, #tpu.memory_space<smem>>
    %52 = arith.index_cast %19 : i32 to index
    %c4 = arith.constant 4 : index
    %53 = memref.load %arg1[%52, %c4] : memref<2x24xf32, #tpu.memory_space<smem>>
    %54 = arith.index_cast %19 : i32 to index
    %c5 = arith.constant 5 : index
    %55 = memref.load %arg1[%54, %c5] : memref<2x24xf32, #tpu.memory_space<smem>>
    %56 = arith.index_cast %19 : i32 to index
    %c3_11 = arith.constant 3 : index
    %57 = memref.load %arg2[%56, %c3_11] : memref<2x24xf32, #tpu.memory_space<smem>>
    %58 = arith.index_cast %19 : i32 to index
    %c4_12 = arith.constant 4 : index
    %59 = memref.load %arg2[%58, %c4_12] : memref<2x24xf32, #tpu.memory_space<smem>>
    %60 = arith.index_cast %19 : i32 to index
    %c5_13 = arith.constant 5 : index
    %61 = memref.load %arg2[%60, %c5_13] : memref<2x24xf32, #tpu.memory_space<smem>>
    %62 = vector.broadcast %51 : f32 to vector<1x256xf32>
    %63 = arith.mulf %62, %9 : vector<1x256xf32>
    %64 = vector.broadcast %53 : f32 to vector<1x256xf32>
    %65 = arith.mulf %64, %6 : vector<1x256xf32>
    %66 = arith.addf %63, %65 : vector<1x256xf32>
    %67 = vector.broadcast %55 : f32 to vector<1x256xf32>
    %68 = arith.addf %66, %67 : vector<1x256xf32>
    %69 = vector.broadcast %57 : f32 to vector<1x256xf32>
    %70 = arith.mulf %69, %9 : vector<1x256xf32>
    %71 = vector.broadcast %59 : f32 to vector<1x256xf32>
    %72 = arith.mulf %71, %6 : vector<1x256xf32>
    %73 = arith.addf %70, %72 : vector<1x256xf32>
    %74 = vector.broadcast %61 : f32 to vector<1x256xf32>
    %75 = arith.addf %73, %74 : vector<1x256xf32>
    %76 = arith.index_cast %19 : i32 to index
    %c6 = arith.constant 6 : index
    %77 = memref.load %arg1[%76, %c6] : memref<2x24xf32, #tpu.memory_space<smem>>
    %78 = arith.index_cast %19 : i32 to index
    %c7 = arith.constant 7 : index
    %79 = memref.load %arg1[%78, %c7] : memref<2x24xf32, #tpu.memory_space<smem>>
    %80 = arith.index_cast %19 : i32 to index
    %c8 = arith.constant 8 : index
    %81 = memref.load %arg1[%80, %c8] : memref<2x24xf32, #tpu.memory_space<smem>>
    %82 = arith.index_cast %19 : i32 to index
    %c6_14 = arith.constant 6 : index
    %83 = memref.load %arg2[%82, %c6_14] : memref<2x24xf32, #tpu.memory_space<smem>>
    %84 = arith.index_cast %19 : i32 to index
    %c7_15 = arith.constant 7 : index
    %85 = memref.load %arg2[%84, %c7_15] : memref<2x24xf32, #tpu.memory_space<smem>>
    %86 = arith.index_cast %19 : i32 to index
    %c8_16 = arith.constant 8 : index
    %87 = memref.load %arg2[%86, %c8_16] : memref<2x24xf32, #tpu.memory_space<smem>>
    %88 = vector.broadcast %77 : f32 to vector<1x256xf32>
    %89 = arith.mulf %88, %9 : vector<1x256xf32>
    %90 = vector.broadcast %79 : f32 to vector<1x256xf32>
    %91 = arith.mulf %90, %6 : vector<1x256xf32>
    %92 = arith.addf %89, %91 : vector<1x256xf32>
    %93 = vector.broadcast %81 : f32 to vector<1x256xf32>
    %94 = arith.addf %92, %93 : vector<1x256xf32>
    %95 = vector.broadcast %83 : f32 to vector<1x256xf32>
    %96 = arith.mulf %95, %9 : vector<1x256xf32>
    %97 = vector.broadcast %85 : f32 to vector<1x256xf32>
    %98 = arith.mulf %97, %6 : vector<1x256xf32>
    %99 = arith.addf %96, %98 : vector<1x256xf32>
    %100 = vector.broadcast %87 : f32 to vector<1x256xf32>
    %101 = arith.addf %99, %100 : vector<1x256xf32>
    %102 = arith.index_cast %19 : i32 to index
    %c9 = arith.constant 9 : index
    %103 = memref.load %arg1[%102, %c9] : memref<2x24xf32, #tpu.memory_space<smem>>
    %104 = arith.index_cast %19 : i32 to index
    %c10 = arith.constant 10 : index
    %105 = memref.load %arg1[%104, %c10] : memref<2x24xf32, #tpu.memory_space<smem>>
    %106 = arith.index_cast %19 : i32 to index
    %c11 = arith.constant 11 : index
    %107 = memref.load %arg1[%106, %c11] : memref<2x24xf32, #tpu.memory_space<smem>>
    %108 = arith.index_cast %19 : i32 to index
    %c9_17 = arith.constant 9 : index
    %109 = memref.load %arg2[%108, %c9_17] : memref<2x24xf32, #tpu.memory_space<smem>>
    %110 = arith.index_cast %19 : i32 to index
    %c10_18 = arith.constant 10 : index
    %111 = memref.load %arg2[%110, %c10_18] : memref<2x24xf32, #tpu.memory_space<smem>>
    %112 = arith.index_cast %19 : i32 to index
    %c11_19 = arith.constant 11 : index
    %113 = memref.load %arg2[%112, %c11_19] : memref<2x24xf32, #tpu.memory_space<smem>>
    %114 = vector.broadcast %103 : f32 to vector<1x256xf32>
    %115 = arith.mulf %114, %9 : vector<1x256xf32>
    %116 = vector.broadcast %105 : f32 to vector<1x256xf32>
    %117 = arith.mulf %116, %6 : vector<1x256xf32>
    %118 = arith.addf %115, %117 : vector<1x256xf32>
    %119 = vector.broadcast %107 : f32 to vector<1x256xf32>
    %120 = arith.addf %118, %119 : vector<1x256xf32>
    %121 = vector.broadcast %109 : f32 to vector<1x256xf32>
    %122 = arith.mulf %121, %9 : vector<1x256xf32>
    %123 = vector.broadcast %111 : f32 to vector<1x256xf32>
    %124 = arith.mulf %123, %6 : vector<1x256xf32>
    %125 = arith.addf %122, %124 : vector<1x256xf32>
    %126 = vector.broadcast %113 : f32 to vector<1x256xf32>
    %127 = arith.addf %125, %126 : vector<1x256xf32>
    %128 = arith.index_cast %19 : i32 to index
    %c12 = arith.constant 12 : index
    %129 = memref.load %arg1[%128, %c12] : memref<2x24xf32, #tpu.memory_space<smem>>
    %130 = arith.index_cast %19 : i32 to index
    %c13 = arith.constant 13 : index
    %131 = memref.load %arg1[%130, %c13] : memref<2x24xf32, #tpu.memory_space<smem>>
    %132 = arith.index_cast %19 : i32 to index
    %c14 = arith.constant 14 : index
    %133 = memref.load %arg1[%132, %c14] : memref<2x24xf32, #tpu.memory_space<smem>>
    %134 = arith.index_cast %19 : i32 to index
    %c12_20 = arith.constant 12 : index
    %135 = memref.load %arg2[%134, %c12_20] : memref<2x24xf32, #tpu.memory_space<smem>>
    %136 = arith.index_cast %19 : i32 to index
    %c13_21 = arith.constant 13 : index
    %137 = memref.load %arg2[%136, %c13_21] : memref<2x24xf32, #tpu.memory_space<smem>>
    %138 = arith.index_cast %19 : i32 to index
    %c14_22 = arith.constant 14 : index
    %139 = memref.load %arg2[%138, %c14_22] : memref<2x24xf32, #tpu.memory_space<smem>>
    %140 = vector.broadcast %129 : f32 to vector<1x256xf32>
    %141 = arith.mulf %140, %9 : vector<1x256xf32>
    %142 = vector.broadcast %131 : f32 to vector<1x256xf32>
    %143 = arith.mulf %142, %6 : vector<1x256xf32>
    %144 = arith.addf %141, %143 : vector<1x256xf32>
    %145 = vector.broadcast %133 : f32 to vector<1x256xf32>
    %146 = arith.addf %144, %145 : vector<1x256xf32>
    %147 = vector.broadcast %135 : f32 to vector<1x256xf32>
    %148 = arith.mulf %147, %9 : vector<1x256xf32>
    %149 = vector.broadcast %137 : f32 to vector<1x256xf32>
    %150 = arith.mulf %149, %6 : vector<1x256xf32>
    %151 = arith.addf %148, %150 : vector<1x256xf32>
    %152 = vector.broadcast %139 : f32 to vector<1x256xf32>
    %153 = arith.addf %151, %152 : vector<1x256xf32>
    %154 = arith.index_cast %19 : i32 to index
    %c15 = arith.constant 15 : index
    %155 = memref.load %arg1[%154, %c15] : memref<2x24xf32, #tpu.memory_space<smem>>
    %156 = arith.index_cast %19 : i32 to index
    %c16 = arith.constant 16 : index
    %157 = memref.load %arg1[%156, %c16] : memref<2x24xf32, #tpu.memory_space<smem>>
    %158 = arith.index_cast %19 : i32 to index
    %c17 = arith.constant 17 : index
    %159 = memref.load %arg1[%158, %c17] : memref<2x24xf32, #tpu.memory_space<smem>>
    %160 = arith.index_cast %19 : i32 to index
    %c15_23 = arith.constant 15 : index
    %161 = memref.load %arg2[%160, %c15_23] : memref<2x24xf32, #tpu.memory_space<smem>>
    %162 = arith.index_cast %19 : i32 to index
    %c16_24 = arith.constant 16 : index
    %163 = memref.load %arg2[%162, %c16_24] : memref<2x24xf32, #tpu.memory_space<smem>>
    %164 = arith.index_cast %19 : i32 to index
    %c17_25 = arith.constant 17 : index
    %165 = memref.load %arg2[%164, %c17_25] : memref<2x24xf32, #tpu.memory_space<smem>>
    %166 = vector.broadcast %155 : f32 to vector<1x256xf32>
    %167 = arith.mulf %166, %9 : vector<1x256xf32>
    %168 = vector.broadcast %157 : f32 to vector<1x256xf32>
    %169 = arith.mulf %168, %6 : vector<1x256xf32>
    %170 = arith.addf %167, %169 : vector<1x256xf32>
    %171 = vector.broadcast %159 : f32 to vector<1x256xf32>
    %172 = arith.addf %170, %171 : vector<1x256xf32>
    %173 = vector.broadcast %161 : f32 to vector<1x256xf32>
    %174 = arith.mulf %173, %9 : vector<1x256xf32>
    %175 = vector.broadcast %163 : f32 to vector<1x256xf32>
    %176 = arith.mulf %175, %6 : vector<1x256xf32>
    %177 = arith.addf %174, %176 : vector<1x256xf32>
    %178 = vector.broadcast %165 : f32 to vector<1x256xf32>
    %179 = arith.addf %177, %178 : vector<1x256xf32>
    %180 = arith.index_cast %19 : i32 to index
    %c18 = arith.constant 18 : index
    %181 = memref.load %arg1[%180, %c18] : memref<2x24xf32, #tpu.memory_space<smem>>
    %182 = arith.index_cast %19 : i32 to index
    %c19 = arith.constant 19 : index
    %183 = memref.load %arg1[%182, %c19] : memref<2x24xf32, #tpu.memory_space<smem>>
    %184 = arith.index_cast %19 : i32 to index
    %c20 = arith.constant 20 : index
    %185 = memref.load %arg1[%184, %c20] : memref<2x24xf32, #tpu.memory_space<smem>>
    %186 = arith.index_cast %19 : i32 to index
    %c18_26 = arith.constant 18 : index
    %187 = memref.load %arg2[%186, %c18_26] : memref<2x24xf32, #tpu.memory_space<smem>>
    %188 = arith.index_cast %19 : i32 to index
    %c19_27 = arith.constant 19 : index
    %189 = memref.load %arg2[%188, %c19_27] : memref<2x24xf32, #tpu.memory_space<smem>>
    %190 = arith.index_cast %19 : i32 to index
    %c20_28 = arith.constant 20 : index
    %191 = memref.load %arg2[%190, %c20_28] : memref<2x24xf32, #tpu.memory_space<smem>>
    %192 = vector.broadcast %181 : f32 to vector<1x256xf32>
    %193 = arith.mulf %192, %9 : vector<1x256xf32>
    %194 = vector.broadcast %183 : f32 to vector<1x256xf32>
    %195 = arith.mulf %194, %6 : vector<1x256xf32>
    %196 = arith.addf %193, %195 : vector<1x256xf32>
    %197 = vector.broadcast %185 : f32 to vector<1x256xf32>
    %198 = arith.addf %196, %197 : vector<1x256xf32>
    %199 = vector.broadcast %187 : f32 to vector<1x256xf32>
    %200 = arith.mulf %199, %9 : vector<1x256xf32>
    %201 = vector.broadcast %189 : f32 to vector<1x256xf32>
    %202 = arith.mulf %201, %6 : vector<1x256xf32>
    %203 = arith.addf %200, %202 : vector<1x256xf32>
    %204 = vector.broadcast %191 : f32 to vector<1x256xf32>
    %205 = arith.addf %203, %204 : vector<1x256xf32>
    %206 = arith.index_cast %19 : i32 to index
    %c21 = arith.constant 21 : index
    %207 = memref.load %arg1[%206, %c21] : memref<2x24xf32, #tpu.memory_space<smem>>
    %208 = arith.index_cast %19 : i32 to index
    %c22 = arith.constant 22 : index
    %209 = memref.load %arg1[%208, %c22] : memref<2x24xf32, #tpu.memory_space<smem>>
    %210 = arith.index_cast %19 : i32 to index
    %c23 = arith.constant 23 : index
    %211 = memref.load %arg1[%210, %c23] : memref<2x24xf32, #tpu.memory_space<smem>>
    %212 = arith.index_cast %19 : i32 to index
    %c21_29 = arith.constant 21 : index
    %213 = memref.load %arg2[%212, %c21_29] : memref<2x24xf32, #tpu.memory_space<smem>>
    %214 = arith.index_cast %19 : i32 to index
    %c22_30 = arith.constant 22 : index
    %215 = memref.load %arg2[%214, %c22_30] : memref<2x24xf32, #tpu.memory_space<smem>>
    %216 = arith.index_cast %19 : i32 to index
    %c23_31 = arith.constant 23 : index
    %217 = memref.load %arg2[%216, %c23_31] : memref<2x24xf32, #tpu.memory_space<smem>>
    %218 = vector.broadcast %207 : f32 to vector<1x256xf32>
    %219 = arith.mulf %218, %9 : vector<1x256xf32>
    %220 = vector.broadcast %209 : f32 to vector<1x256xf32>
    %221 = arith.mulf %220, %6 : vector<1x256xf32>
    %222 = arith.addf %219, %221 : vector<1x256xf32>
    %223 = vector.broadcast %211 : f32 to vector<1x256xf32>
    %224 = arith.addf %222, %223 : vector<1x256xf32>
    %225 = vector.broadcast %213 : f32 to vector<1x256xf32>
    %226 = arith.mulf %225, %9 : vector<1x256xf32>
    %227 = vector.broadcast %215 : f32 to vector<1x256xf32>
    %228 = arith.mulf %227, %6 : vector<1x256xf32>
    %229 = arith.addf %226, %228 : vector<1x256xf32>
    %230 = vector.broadcast %217 : f32 to vector<1x256xf32>
    %231 = arith.addf %229, %230 : vector<1x256xf32>
    %232 = tpu.concatenate %42, %68, %94, %120, %146, %172, %198, %224 in 1 : vector<1x256xf32>, vector<1x256xf32>, vector<1x256xf32>, vector<1x256xf32>, vector<1x256xf32>, vector<1x256xf32>, vector<1x256xf32>, vector<1x256xf32> -> vector<1x2048xf32>
    %233 = tpu.concatenate %49, %75, %101, %127, %153, %179, %205, %231 in 1 : vector<1x256xf32>, vector<1x256xf32>, vector<1x256xf32>, vector<1x256xf32>, vector<1x256xf32>, vector<1x256xf32>, vector<1x256xf32>, vector<1x256xf32> -> vector<1x2048xf32>
    %234 = vector.broadcast %232 : vector<1x2048xf32> to vector<16x2048xf32>
    %235 = arith.subf %234, %15 : vector<16x2048xf32>
    %236 = math.absf %235 : vector<16x2048xf32>
    %cst_32 = arith.constant 1.000000e+00 : f32
    %237 = vector.broadcast %cst_32 : f32 to vector<16x2048xf32>
    %238 = arith.subf %237, %236 : vector<16x2048xf32>
    %cst_33 = arith.constant 0.000000e+00 : f32
    %239 = vector.broadcast %cst_33 : f32 to vector<16x2048xf32>
    %240 = arith.maximumf %239, %238 : vector<16x2048xf32>
    %241 = vector.broadcast %233 : vector<1x2048xf32> to vector<16x2048xf32>
    %242 = arith.subf %241, %17 : vector<16x2048xf32>
    %243 = math.absf %242 : vector<16x2048xf32>
    %cst_34 = arith.constant 1.000000e+00 : f32
    %244 = vector.broadcast %cst_34 : f32 to vector<16x2048xf32>
    %245 = arith.subf %244, %243 : vector<16x2048xf32>
    %cst_35 = arith.constant 0.000000e+00 : f32
    %246 = vector.broadcast %cst_35 : f32 to vector<16x2048xf32>
    %247 = arith.maximumf %246, %245 : vector<16x2048xf32>
    %cst_36 = arith.constant dense<0.000000e+00> : vector<16x2048xf32>
    %248 = tpu.matmul %21, %240, %cst_36 {dimension_numbers = #tpu.dot_dimension_numbers<[1], [0], [0], [1], [0, 0, 1, 1], [], []>} : vector<16x16xf32>, vector<16x2048xf32>, vector<16x2048xf32> -> vector<16x2048xf32>
    %249 = arith.mulf %247, %248 : vector<16x2048xf32>
    %cst_37 = arith.constant dense<0.000000e+00> : vector<2048xf32>
    %250 = vector.multi_reduction <add>, %249, %cst_37 [0] : vector<16x2048xf32> to vector<2048xf32>
    %251 = vector.shape_cast %250 : vector<2048xf32> to vector<1x2048xf32>
    %252 = vector.extract_strided_slice %251 {offsets = [0, 0], sizes = [1, 256], strides = [1, 1]} : vector<1x2048xf32> to vector<1x256xf32>
    %253 = vector.extract_strided_slice %251 {offsets = [0, 256], sizes = [1, 256], strides = [1, 1]} : vector<1x2048xf32> to vector<1x256xf32>
    %254 = vector.extract_strided_slice %251 {offsets = [0, 512], sizes = [1, 256], strides = [1, 1]} : vector<1x2048xf32> to vector<1x256xf32>
    %255 = vector.extract_strided_slice %251 {offsets = [0, 768], sizes = [1, 256], strides = [1, 1]} : vector<1x2048xf32> to vector<1x256xf32>
    %256 = vector.extract_strided_slice %251 {offsets = [0, 1024], sizes = [1, 256], strides = [1, 1]} : vector<1x2048xf32> to vector<1x256xf32>
    %257 = vector.extract_strided_slice %251 {offsets = [0, 1280], sizes = [1, 256], strides = [1, 1]} : vector<1x2048xf32> to vector<1x256xf32>
    %258 = vector.extract_strided_slice %251 {offsets = [0, 1536], sizes = [1, 256], strides = [1, 1]} : vector<1x2048xf32> to vector<1x256xf32>
    %259 = vector.extract_strided_slice %251 {offsets = [0, 1792], sizes = [1, 256], strides = [1, 1]} : vector<1x2048xf32> to vector<1x256xf32>
    %260 = tpu.concatenate %252, %253, %254, %255, %256, %257, %258, %259 in 0 : vector<1x256xf32>, vector<1x256xf32>, vector<1x256xf32>, vector<1x256xf32>, vector<1x256xf32>, vector<1x256xf32>, vector<1x256xf32>, vector<1x256xf32> -> vector<8x256xf32>
    %261 = vector.broadcast %23 : vector<1x256xf32> to vector<8x256xf32>
    %262 = arith.subf %260, %261 : vector<8x256xf32>
    %263 = math.absf %262 : vector<8x256xf32>
    %cst_38 = arith.constant 0.000000e+00 : f32
    %cst_39 = arith.constant 3.906250e-03 : f32
    %264 = arith.subf %cst_38, %cst_39 : f32
    %cst_40 = arith.constant dense<0.000000e+00> : vector<8xf32>
    %265 = vector.multi_reduction <add>, %263, %cst_40 [1] : vector<8x256xf32> to vector<8xf32>
    %266 = vector.shape_cast %265 : vector<8xf32> to vector<8x1xf32>
    %267 = vector.broadcast %264 : f32 to vector<8x1xf32>
    %268 = arith.mulf %267, %266 : vector<8x1xf32>
    %269 = vector.shape_cast %268 : vector<8x1xf32> to vector<1x8x1xf32>
    %c0_41 = arith.constant 0 : index
    %c0_42 = arith.constant 0 : index
    %c0_43 = arith.constant 0 : index
    %270 = vector.load %arg5[%c0_41, %c0_42, %c0_43] : memref<1x8x1xf32, #tpu.memory_space<vmem>>, vector<1x8x1xf32>
    tpu.vector_store %arg5[%c0_41, %c0_42, %c0_43], %269 {strides = array<i32>} : memref<1x8x1xf32, #tpu.memory_space<vmem>>, vector<1x8x1xf32>,
    return
  }
  func.func @transform_0(%arg0: i32) -> (i32, i32) {
    %c0_i32 = arith.constant 0 : i32
    %c0_i32_0 = arith.constant 0 : i32
    %c0_i32_1 = arith.constant 0 : i32
    return %c0_i32, %c0_i32_0 : i32, i32
  }
  func.func @transform_1(%arg0: i32) -> (i32, i32) {
    %c0_i32 = arith.constant 0 : i32
    %c0_i32_0 = arith.constant 0 : i32
    %c0_i32_1 = arith.constant 0 : i32
    return %c0_i32, %c0_i32_0 : i32, i32
  }
  func.func @transform_2(%arg0: i32) -> (i32, i32, i32) {
    %c0_i32 = arith.constant 0 : i32
    %c0_i32_0 = arith.constant 0 : i32
    %c0_i32_1 = arith.constant 0 : i32
    return %arg0, %c0_i32, %c0_i32_0 : i32, i32, i32
  }
  func.func @transform_3(%arg0: i32) -> (i32, i32, i32) {
    %c0_i32 = arith.constant 0 : i32
    %c0_i32_0 = arith.constant 0 : i32
    %c0_i32_1 = arith.constant 0 : i32
    return %arg0, %c0_i32, %c0_i32_0 : i32, i32, i32
  }
  func.func @transform_4(%arg0: i32) -> (i32, i32, i32) {
    %c0_i32 = arith.constant 0 : i32
    %c0_i32_0 = arith.constant 0 : i32
    %c0_i32_1 = arith.constant 0 : i32
    return %arg0, %c0_i32, %c0_i32_0 : i32, i32, i32
  }
}

</mosaic_0001>

<bundles_post_ra>
// kernel: tpu_custom_call.1
= control target key start
LH: loop header
LB: loop body
LE: loop exit
PB: predicated region body
PF: predicated region fallthrough
CT: control target
= control target key end

     0   :  { %9 = vsyncpa [#allocation4], 0  ;;  %s2767_s0 = inlined_call_operand.hbm [shape: f32[2,24], index: 0, kind: input, shape index: {}]   ;;  %s2768_s1 = inlined_call_operand.hbm [shape: f32[2,24], index: 1, kind: input, shape index: {}]   ;;  %s2769_s2 = inlined_call_operand.hbm [shape: f32[2,16,16], index: 2, kind: input, shape index: {}]   ;;  %s2770_s3 = inlined_call_operand.vmem [shape: f32[2,1,256], index: 3, kind: input, shape index: {}]   ;;  %s2771_s4 = inlined_call_operand.vmem [shape: f32[2,8,1], index: 4, kind: output, shape index: {}]  }
   0x1   :  { %10 = vsyncpa [#allocation6], 0 }
   0x2   :  { %11 = vsyncpa [#allocation3], 0 }
   0x3   :  { %13 = vsyncpa [#allocation3 + $0x1], 0  ;;  %s2041_s15 = smov 0   ;;  %s2043_s16 = smov 0  }
   0x4   :  { %s2045_s17 = smov 0   ;;  %s2047_s18 = smov 0  }
   0x5 LB: > { %s2060_s19 = sadd.s32 4294967295, %s2008_s18   ;;  %s2063_s20 = sadd.s32 1, %s2008_s18   ;;  %s2008_s18 = sphi %s2047_s18, %s2805_s18   ;;  %s2004_s17 = sphi %s2045_s17, %s2804_s17   ;;  %s2000_s16 = sphi %s2043_s16, %s2803_s16   ;;  %s1996_s15 = sphi %s2041_s15, %s2802_s15  }
   0x6   : > { %s65_s21 = ssub.s32 %s2008_s18, %s2063_s20  ;;  %s68_s22 = sadd.s32 1, %s2004_s17 }
   0x7   : > { %p66_p0 = scmp.eq.s32.totalorder %s65_s21, 0  ;;  %p75_p1 = scmp.ne.s32.totalorder %s2004_s17, %s2000_s16 }
   0x8   : > { %p76_p2 = scmp.eq.s32.totalorder %s2008_s18, 0  ;;  %p81_p3 = scmp.ne.s32.totalorder %s2000_s16, %s1996_s15 }
   0x9   : > { %s2073_s23 = scalar_select %p66_p0, %s2004_s17, %s68_s22  }
   0xa   : > { %p77_p4 = por %p76_p2, %p75_p1  ;;  %p2772_p5 = scmp.eq.s32.totalorder %s2060_s19, 0 }
   0xb   : > { %p1820_p6 = scmp.ge.s32.totalorder %s2008_s18, 1  ;;  %p144_p7 = scmp.lt.s32.totalorder %s2008_s18, 3 }
   0xc   : > { %p2080_p8 = por %p2772_p5, %p81_p3  ;;  %p1876_p10 = scmp.lt.s32.totalorder %s2008_s18, 2 }
   0xd   : > { %p2084_p9 = pnand %p1820_p6, %p144_p7  ;;  %s175_s27 = sand.u32 1, %s2004_s17  }
   0xe   : > { %s2784_s24 = scalar_select %p2080_p8, 1, 0 }
   0xf   : > { %s2785_s25 = scalar_select %p2084_p9, 1, 0 }
  0x10   : > { %p1863_p11 = pneg %p2084_p9  ;;  %p2091_p12 = pnand %p1876_p10, %p77_p4 }
  0x11   : > { %s1824_s28 = sshll.u32 %s175_s27, 4  ;;  %s2010_s29 = smov [#allocation2]  }
  0x12   : > { %p1864_p13 = pnand %p1863_p11, %p2772_p5  ;;  %s2011_s6 = smov [#allocation5]  }
  0x13   : > { %s1852_s9 = sshll.u32 %s2008_s18, 8  ;;  %s179_s10 = scalar_lea.vmem [#allocation7], %s1824_s28 }
  0x14   : > { %1866 = dma.hbm_to_smem (!%p1864_p13), %s2767_s0, 32, %s2010_s29, [#allocation4]  }
  0x15   : > { %1869 = dma.hbm_to_smem (!%p1864_p13), %s2768_s1, 32, %s2011_s6, [#allocation6]  }
  0x16   : > { %s186_s11 = sshll.u32 %s179_s10, 4  ;;  %s2108_s14 = scalar_lea.hbm %s2769_s2, %s1852_s9  ;;  %s2110_s11 = int_to_ptr.vmem [resolvable:$true] %s186_s11 }
  0x17   : > { %s2112_s15 = scalar_lea.sflag [#allocation3], %s175_s27  ;;  %s1938_s21 = scalar_lea.hbm %s2108_s14, 256 }
  0x18   : > { %p1939_p0 = scmp.ne.s32.totalorder %s2108_s14, %s1938_s21  ;;  %p1940_p1 = pneg %p2091_p12 }
  0x19   : > { %s1943_s28 = scalar_lea.hbm %s2769_s2, 512  ;;  %p1944_p4 = scmp.lt.s32.totalorder %s2108_s14, %s2769_s2 }
  0x1a   : > { %p1941_p2 = pnand %p1940_p1, %p1939_p0  ;;  %p1945_p6 = scmp.lt.s32.totalorder %s1943_s28, %s1938_s21 }
  0x1c   : > { %p1942_p3 = pneg %p1941_p2  ;;  %p1946_p7 = por %p1945_p6, %p1944_p4 }
  0x1e   : > { %p1947_p10 = pnand %p1946_p7, %p1942_p3 }
  0x20   : > { %1950 = shalt.err (!%p1947_p10)
}
  0x21   : > { %s1951_s27 = scalar_lea.vmem %s2110_s11, 256  ;;  %s2012_s5 = smov [#allocation7]  }
  0x22   : > { %p1952_p11 = scmp.ne.s32.totalorder %s2110_s11, %s1951_s27  ;;  %s1956_s6 = sshll.u32 %s2012_s5, 4  ;;  %s1957_s6 = int_to_ptr.vmem [resolvable:$false] %s1956_s6 }
  0x23   : > { %s1958_s7 = scalar_lea.vmem %s1957_s6, 512  ;;  %p1959_p2 = scmp.lt.s32.totalorder %s2110_s11, %s1957_s6 }
  0x24   : > { %p1954_p13 = pnand %p1952_p11, %p1940_p1  ;;  %p1960_p5 = scmp.lt.s32.totalorder %s1958_s7, %s1951_s27 }
  0x26   : > { %p1955_p0 = pneg %p1954_p13  ;;  %p1961_p8 = por %p1960_p5, %p1959_p2 }
  0x28   : > { %p1962_p9 = pnand %p1961_p8, %p1955_p0 }
  0x2a   : > { %1965 = shalt.err (!%p1962_p9)
}
  0x2b   : > { %s2013_s8 = smov 128   ;;  %s2014_s9 = smov 8  }
  0x2c   : > { %1873 = dma.hbm_to_vmem [thread:$0]  (!%p2091_p12), %s2108_s14, 256, %s2110_s11, %s2112_s15, %s2013_s8, %s2013_s8, %s2014_s9  }
  0x2d   : > { %p2787_p1 = scmp.ne.s32.totalorder %s2785_s25, 0 }
  0x2e   : > { %p2788_p3 = scmp.eq.s32.totalorder (!%p2787_p1), %s2060_s19, 0 }
  0x2f   : > { %205 = sbr.rel (%p2787_p1) target bundleno = 506 (0x1fa), region = 36 }
  0x34   : > { %1983 = dma.done.wait (%p2788_p3), [#allocation4], 32   ;;  %p2789_p4 = pmov %p2788_p3 }
  0x35   : > { %p2790_p5 = pmov %p2788_p3 }
  0x36   : > { %1985 = vsyncadd (%p2789_p4), [#allocation4], 4294967264 }
  0x37   : > { %1987 = dma.done.wait (%p2790_p5), [#allocation6], 32   ;;  %p2791_p8 = pmov %p2788_p3 }
  0x38   : > { %s215_s10 = sand.u32 1, %s2000_s16   ;;  %p2792_p9 = scmp.ne.s32.totalorder %s2784_s24, 0 }
  0x39   : > { %1989 = vsyncadd (%p2791_p8), [#allocation6], 4294967264  ;;  %s2144_s26 = sshll.u32 %s215_s10, 4  ;;  %s216_s25 = scalar_lea.sflag [#allocation3], %s215_s10 }
  0x3a   : > { %s219_s11 = scalar_lea.vmem [#allocation7], %s2144_s26 }
  0x3b   : > { %1991 = dma.done.wait (%p2792_p9), %s216_s25, 256  }
  0x3c   : > { %1993 = vsyncadd (%p2792_p9), %s216_s25, 4294967040 }
  0x3d   : > { %224 = sfence }
  0x3e   : > { %v256_v0 = vlaneseq  ;;  %s2152_s12 = sshll.u32 %s2060_s19, 7  ;;  %v2015_v1 = vmov 0.0   ;;  %vm911_vm0 = vcmask 130048   ;;  %vm1678_vm1 = vcmask 1040384   ;;  %p248_p12 = scmp.lt.s32.totalorder %s2060_s19, 1 }
  0x3f   : > { %s281_s13 = sadd.s32 1, %s2152_s12  ;;  %982 = vmatprep.mubr.f32.mxu0 %v2015_v1  ;;  %1059 = vmatprep.mubr.f32.mxu1 %v2015_v1  ;;  %s2158_s24 = sld [smem:[#allocation2 + %s2152_s12]]  ;;  %vm1681_vm2 = vcmask 1041408   ;;  %vm1684_vm3 = vcmask 1042432   ;;  %vm1687_vm4 = vcmask 1043456   ;;  %vm1690_vm5 = vcmask 1044480  }
  0x40   : > { %v257_v2 = vand.u32 127, %v256_v0  ;;  %s310_s14 = sadd.s32 3, %s2152_s12  ;;  %s2161_s15 = sld [smem:[#allocation2 + %s281_s13]]  ;;  %v2176_v8 = vshrl.u32 %v256_v0, 7  ;;  %vm1693_vm6 = vcmask 1045504   ;;  %vm1696_vm7 = vcmask 1046528  }
  0x41   : > { %s312_s21 = sadd.s32 4, %s2152_s12  ;;  %s2164_s18 = sld [smem:[#allocation5 + %s281_s13]]  ;;  %vm1718_vm8 = vcmask 7168  }
  0x42   : > { %v258_v3 = vadd.s32 128, %v257_v2  ;;  %v259_v4 = vcvt.s32.f32 %v257_v2  ;;  %s283_s22 = sadd.s32 2, %s2152_s12  ;;  %s2169_s28 = sld [smem:[#allocation2 + %s310_s14]]  ;;  %v273_v13 = vadd.s32 8, %v2176_v8  ;;  %v2201_v15 = vcvt.s32.f32 %v2176_v8 }
  0x43   : > { %s2173_s29 = sld [smem:[#allocation2 + %s312_s21]]  ;;  %s314_s30 = sadd.s32 5, %s2152_s12  ;;  %v2219_v22 = vsub.s32 0, %v2176_v8 }
  0x44   : > { %v260_v5 = vcvt.s32.f32 %v258_v3  ;;  %v261_v6 = vadd.f32 0.5, %v259_v4  ;;  %s2180_s27 = sld [smem:[#allocation2 + %s283_s22]]  ;;  %s341_s5 = sadd.s32 6, %s2152_s12  ;;  %v2231_v27 = vcvt.s32.f32 %v273_v13 }
  0x45   : > { %s2185_s6 = sld [smem:[#allocation2 + %s314_s30]]  ;;  %s343_s7 = sadd.s32 7, %s2152_s12  ;;  %v288_v19 = vstv %s2158_s24 }
  0x46   : > { %v262_v7 = vadd.f32 0.5, %v260_v5  ;;  %v263_v9 = vmul.f32 0.0625, %v261_v6  ;;  %s345_s8 = sadd.s32 8, %s2152_s12  ;;  %v291_v14 = vstv %s2161_s15  ;;  %s2197_s9 = sld [smem:[#allocation2 + %s341_s5]] }
  0x47   : > { %s372_s10 = sadd.s32 9, %s2152_s12  ;;  %s2207_s25 = sld [smem:[#allocation2 + %s343_s7]]  ;;  %v302_v21 = vstv %s2164_s18 }
  0x48   : > { %v264_v10 = vmul.f32 0.0625, %v262_v7  ;;  %v2188_v11 = vfloor.f32 %v263_v9  ;;  %s374_s13 = sadd.s32 10, %s2152_s12  ;;  %v319_v20 = vstv %s2169_s28  ;;  %s2215_s15 = sld [smem:[#allocation2 + %s345_s8]] }
  0x49   : > { %v322_v16 = vstv %s2173_s29  ;;  %s2227_s29 = sld [smem:[#allocation2 + %s372_s10]]  ;;  %s376_s28 = sadd.s32 11, %s2152_s12 }
  0x4a   : > { %v2191_v12 = vfloor.f32 %v264_v10  ;;  %v267_v17 = vmul.f32 16.0, %v2188_v11  ;;  %v292_v24 = vmul.f32 %v291_v14, %v2188_v11  ;;  %v323_v25 = vmul.f32 %v322_v16, %v2188_v11  ;;  %s2237_s24 = sld [smem:[#allocation2 + %s374_s13]]  ;;  %s2807_s19 = smov (!%p248_p12, %s2060_s19), 1 }
  0x4b   : > { %v296_v30 = vstv %s2180_s27  ;;  %v2245_v33 = vmul.f32 %v302_v21, %v2188_v11  ;;  %v327_v36 = vstv %s2185_s6  ;;  %s2777_s27 = sadd.s32 12, %s2152_s12  ;;  %s2776_s6 = sadd.s32 13, %s2152_s12 }
  0x4c   : > { %v268_v18 = vmul.f32 16.0, %v2191_v12  ;;  %v2221_v23 = vsub.f32 %v259_v4, %v267_v17  ;;  %v293_v28 = vmul.f32 %v291_v14, %v2191_v12  ;;  %v324_v29 = vmul.f32 %v322_v16, %v2191_v12  ;;  %s378_s18 = sld [smem:[#allocation5 + %s372_s10]]  ;;  %s2794_s10 = sadd.s32 13, %s2152_s12 }
  0x4d   : > { %v350_v37 = vstv %s2197_s9  ;;  %v353_v44 = vstv %s2207_s25  ;;  %s2266_s9 = sld [smem:[#allocation2 + %s376_s28]]  ;;  %s2775_s25 = sadd.s32 14, %s2152_s12 }
  0x4e   : > { %v2229_v26 = vsub.f32 %v260_v5, %v268_v18  ;;  %v289_v31 = vmul.f32 %v288_v19, %v2221_v23  ;;  %v320_v32 = vmul.f32 %v319_v20, %v2221_v23  ;;  %v351_v40 = vmul.f32 %v350_v37, %v2221_v23 }
  0x4f   : > { %v358_v45 = vstv %s2215_s15  ;;  %v354_v48 = vmul.f32 %v353_v44, %v2188_v11  ;;  %v355_v49 = vmul.f32 %v353_v44, %v2191_v12  ;;  %v381_v52 = vstv %s2227_s29  ;;  %s2275_s15 = sld [smem:[#allocation2 + %s2777_s27]] }
  0x50   : > { %v290_v34 = vmul.f32 %v288_v19, %v2229_v26  ;;  %v321_v35 = vmul.f32 %v319_v20, %v2229_v26  ;;  %v294_v38 = vadd.f32 %v292_v24, %v289_v31  ;;  %v325_v39 = vadd.f32 %v323_v25, %v320_v32  ;;  %s2283_s29 = sld [smem:[#allocation2 + %s2776_s6]]  ;;  %s2781_s6 = sadd.s32 16, %s2152_s12 }
  0x51   : > { %v352_v41 = vmul.f32 %v350_v37, %v2229_v26  ;;  %v384_v53 = vstv %s2237_s24  ;;  %v356_v56 = vadd.f32 %v354_v48, %v351_v40  ;;  %v382_v60 = vmul.f32 %v381_v52, %v2221_v23  ;;  %s2291_s24 = sld [smem:[#allocation2 + %s2775_s25]]  ;;  %s434_s25 = sadd.s32 15, %s2152_s12 }
  0x52   : > { %v295_v42 = vadd.f32 %v293_v28, %v290_v34  ;;  %v326_v43 = vadd.f32 %v324_v29, %v321_v35  ;;  %v297_v46 = vadd.f32 %v296_v30, %v294_v38  ;;  %v328_v47 = vadd.f32 %v327_v36, %v325_v39  ;;  %s2310_s27 = sld [smem:[#allocation2 + %s434_s25]] }
  0x53   : > { %v357_v57 = vadd.f32 %v355_v49, %v352_v41  ;;  %v383_v61 = vmul.f32 %v381_v52, %v2229_v26  ;;  %v359_v13 = vadd.f32 %v358_v45, %v356_v56  ;;  %v385_v44 = vmul.f32 %v384_v53, %v2188_v11  ;;  %v2303_v49 = vld [vmem:[%s219_s11] sm:$0xff] }
  0x54   : > { %v298_v50 = vadd.f32 %v296_v30, %v295_v42  ;;  %v329_v51 = vadd.f32 %v327_v36, %v326_v43  ;;  %v530_v54 = vrot.slane %v297_v46, %v2219_v22  ;;  %v538_v55 = vrot.slane %v328_v47, %v2219_v22 }
  0x55   : > { %v360_v18 = vadd.f32 %v358_v45, %v357_v57  ;;  %v546_v43 = vrot.slane %v359_v13, %v2219_v22  ;;  %v386_v46 = vmul.f32 %v384_v53, %v2191_v12  ;;  %v389_v47 = vstv %s2266_s9  ;;  %s2317_s9 = sld [smem:[#allocation2 + %s2781_s6]]  ;;  %s2783_s6 = sadd.s32 22, %s2152_s12 }
  0x56   : > { %v534_v58 = vrot.slane %v298_v50, %v2219_v22  ;;  %v542_v59 = vrot.slane %v329_v51, %v2219_v22  ;;  %v607_v62 = vsub.f32 %v530_v54, %v2231_v27  ;;  %v609_v63 = vsub.f32 %v538_v55, %v2231_v27 }
  0x57   : > { %v591_v0 = vsub.f32 %v530_v54, %v2201_v15  ;;  %v593_v2 = vsub.f32 %v538_v55, %v2201_v15  ;;  %v550_v42 = vrot.slane %v360_v18, %v2219_v22  ;;  %v412_v48 = vstv %s2275_s15  ;;  %s2779_s15 = sadd.s32 17, %s2152_s12 }
  0x58   : > { %v608_v3 = vsub.f32 %v534_v58, %v2231_v27  ;;  %v610_v4 = vsub.f32 %v542_v59, %v2231_v27  ;;  %v592_v5 = vsub.f32 %v534_v58, %v2201_v15  ;;  %v594_v6 = vsub.f32 %v542_v59, %v2201_v15  ;;  %s2341_s26 = sld [smem:[#allocation2 + %s2779_s15]]  ;;  %s2782_s15 = sadd.s32 20, %s2152_s12 }
  0x59   : > { %v639_v7 = vand.u32 2147483647, %v607_v62  ;;  %v641_v9 = vand.u32 2147483647, %v609_v63  ;;  %v623_v10 = vand.u32 2147483647, %v591_v0  ;;  %v612_v50 = vsub.f32 %v550_v42, %v2231_v27 }
  0x5a   : > { %v640_v14 = vand.u32 2147483647, %v608_v3  ;;  %v642_v16 = vand.u32 2147483647, %v610_v4  ;;  %v624_v17 = vand.u32 2147483647, %v592_v5  ;;  %v611_v51 = vsub.f32 %v546_v43, %v2231_v27 }
  0x5b   : > { %v671_v19 = vsub.f32 1.0, %v639_v7  ;;  %v673_v20 = vsub.f32 1.0, %v641_v9  ;;  %v626_v24 = vand.u32 2147483647, %v594_v6  ;;  %v655_v25 = vsub.f32 1.0, %v623_v10  ;;  %v2331_v6 = vld [vmem:[%s219_s11 + $0x8] sm:$0xff] }
  0x5c   : > { %v672_v28 = vsub.f32 1.0, %v640_v14  ;;  %v674_v29 = vsub.f32 1.0, %v642_v16  ;;  %v656_v30 = vsub.f32 1.0, %v624_v17  ;;  %v625_v31 = vand.u32 2147483647, %v593_v2 }
  0x5d   : > { %v703_v32 = vmax.f32 %v671_v19, 0.0  ;;  %v705_v34 = vmax.f32 %v673_v20, 0.0  ;;  %v658_v35 = vsub.f32 1.0, %v626_v24  ;;  %v687_v36 = vmax.f32 %v655_v25, 0.0 }
  0x5e   : > { %v704_v37 = vmax.f32 %v672_v28, 0.0  ;;  %v706_v38 = vmax.f32 %v674_v29, 0.0  ;;  %v688_v39 = vmax.f32 %v656_v30, 0.0  ;;  %v657_v40 = vsub.f32 1.0, %v625_v31 }
  0x5f   : > { %v690_v41 = vmax.f32 %v658_v35, 0.0  ;;  %v387_v52 = vadd.f32 %v385_v44, %v382_v60  ;;  %v415_v54 = vstv %s2283_s29  ;;  %v388_v53 = vadd.f32 %v386_v46, %v383_v61  ;;  %s2778_s29 = sadd.s32 18, %s2152_s12 }
  0x60   : > { %946 = vmatprep.subr.mxu0 %v704_v37  ;;  %1023 = vmatprep.subr.mxu1 %v706_v38  ;;  %v689_v45 = vmax.f32 %v657_v40, 0.0  ;;  %v596_v55 = vsub.f32 %v550_v42, %v2201_v15  ;;  %v595_v56 = vsub.f32 %v546_v43, %v2201_v15  ;;  %v420_v57 = vstv %s2291_s24  ;;  %s2351_s11 = sld [smem:[#allocation2 + %s2778_s29]]  ;;  %s2780_s24 = sadd.s32 19, %s2152_s12 }
  0x61   : > { %947 = vmatpush1.msra.mxu0 %v703_v32  ;;  %1024 = vmatpush1.msra.mxu1 %v705_v34  ;;  %v644_v58 = vand.u32 2147483647, %v612_v50  ;;  %v643_v59 = vand.u32 2147483647, %v611_v51  ;;  %v390_v60 = vadd.f32 %v389_v47, %v387_v52  ;;  %v413_v62 = vmul.f32 %v412_v48, %v2221_v23  ;;  %s2360_s29 = sld [smem:[#allocation2 + %s2780_s24]] }
  0x62   : > { %948 = vmatprep.subr.mxu0 %v688_v39  ;;  %1025 = vmatprep.subr.mxu1 %v690_v41  ;;  %v391_v61 = vadd.f32 %v389_v47, %v388_v53  ;;  %v628_v63 = vand.u32 2147483647, %v596_v55  ;;  %v627_v0 = vand.u32 2147483647, %v595_v56  ;;  %v414_v2 = vmul.f32 %v412_v48, %v2229_v26 }
  0x63   : > { %949 = vmatpush1.msra.mxu0 %v687_v36  ;;  %1026 = vmatpush1.msra.mxu1 %v689_v45  ;;  %v676_v3 = vsub.f32 1.0, %v644_v58  ;;  %v675_v4 = vsub.f32 1.0, %v643_v59  ;;  %v554_v5 = vrot.slane %v390_v60, %v2219_v22  ;;  %v416_v7 = vmul.f32 %v415_v54, %v2188_v11 }
  0x64   : > { %1834 = vmatmul.mubr.msk.f32.vlgmr.msra.gmra.mxu0 %vm911_vm0, %v2303_v49  ;;  %1836 = vmatmul.mubr.msk.f32.vlgmr.msra.gmra.mxu1 %vm911_vm0, %v2303_v49  ;;  %v558_v9 = vrot.slane %v391_v61, %v2219_v22  ;;  %v660_v10 = vsub.f32 1.0, %v628_v63  ;;  %v659_v13 = vsub.f32 1.0, %v627_v0  ;;  %v417_v14 = vmul.f32 %v415_v54, %v2191_v12 }
  0x65   : > { %988 = vmatprep.mubr.f32.mxu0 %v2015_v1  ;;  %1065 = vmatprep.mubr.f32.mxu1 %v2015_v1  ;;  %v708_v16 = vmax.f32 %v676_v3, 0.0  ;;  %v707_v17 = vmax.f32 %v675_v4, 0.0  ;;  %v613_v18 = vsub.f32 %v554_v5, %v2231_v27  ;;  %v597_v19 = vsub.f32 %v554_v5, %v2201_v15 }
  0x66   : > { %v614_v20 = vsub.f32 %v558_v9, %v2231_v27  ;;  %v692_v24 = vmax.f32 %v660_v10, 0.0  ;;  %v691_v25 = vmax.f32 %v659_v13, 0.0  ;;  %v598_v28 = vsub.f32 %v558_v9, %v2201_v15 }
  0x67   : > { %1100 = vmatprep.subr.mxu0 %v708_v16  ;;  %v645_v29 = vand.u32 2147483647, %v613_v18  ;;  %v629_v30 = vand.u32 2147483647, %v597_v19  ;;  %v418_v31 = vadd.f32 %v416_v7, %v413_v62  ;;  %v419_v32 = vadd.f32 %v417_v14, %v414_v2 }
  0x68   : > { %1835 = vmatmul.mubr.msk.f32.gmra.mxu0 %vm911_vm0, %v2331_v6  ;;  %1837 = vmatmul.mubr.msk.f32.gmra.mxu1 %vm911_vm0, %v2331_v6  ;;  %v646_v34 = vand.u32 2147483647, %v614_v20  ;;  %v630_v35 = vand.u32 2147483647, %v598_v28  ;;  %v443_v36 = vstv %s2310_s27  ;;  %v446_v37 = vstv %s2317_s9  ;;  %s496_s27 = sadd.s32 21, %s2152_s12  ;;  %s2379_s9 = sld [smem:[#allocation2 + %s2782_s15]] }
  0x69   : > { %1136 = vmatprep.mubr.f32.mxu0 %v2015_v1  ;;  %1101 = vmatpush1.msra.mxu0 %v707_v17  ;;  %v677_v38 = vsub.f32 1.0, %v645_v29  ;;  %v661_v39 = vsub.f32 1.0, %v629_v30  ;;  %v421_v40 = vadd.f32 %v420_v57, %v418_v31  ;;  %v422_v41 = vadd.f32 %v420_v57, %v419_v32  ;;  %s2385_s24 = sld [smem:[#allocation2 + %s496_s27]] }
  0x6a   : > { %1213 = vmatprep.mubr.f32.mxu1 %v2015_v1  ;;  %1102 = vmatprep.subr.mxu0 %v692_v24  ;;  %v678_v42 = vsub.f32 1.0, %v646_v34  ;;  %v662_v43 = vsub.f32 1.0, %v630_v35  ;;  %v444_v44 = vmul.f32 %v443_v36, %v2221_v23  ;;  %v445_v45 = vmul.f32 %v443_v36, %v2229_v26  ;;  %s2416_s15 = sld [smem:[#allocation5 + %s2152_s12]] }
  0x6b   : > { %1103 = vmatpush1.msra.mxu0 %v691_v25  ;;  %v709_v46 = vmax.f32 %v677_v38, 0.0  ;;  %v693_v47 = vmax.f32 %v661_v39, 0.0  ;;  %v566_v48 = vrot.slane %v422_v41, %v2219_v22  ;;  %v562_v50 = vrot.slane %v421_v40, %v2219_v22 }
  0x6c   : > { %1838 = vmatmul.mubr.msk.f32.vlgmr.msra.gmra.mxu0 %vm911_vm0, %v2303_v49  ;;  %v710_v51 = vmax.f32 %v678_v42, 0.0  ;;  %v694_v52 = vmax.f32 %v662_v43, 0.0  ;;  %v447_v54 = vmul.f32 %v446_v37, %v2188_v11  ;;  %v448_v53 = vmul.f32 %v446_v37, %v2191_v12 }
  0x6d   : > { %1142 = vmatprep.mubr.f32.mxu0 %v2015_v1  ;;  %v616_v55 = vsub.f32 %v566_v48, %v2231_v27  ;;  %v615_v56 = vsub.f32 %v562_v50, %v2231_v27  ;;  %v451_v57 = vstv %s2341_s26  ;;  %v600_v58 = vsub.f32 %v566_v48, %v2201_v15  ;;  %s2396_s26 = sld [smem:[#allocation2 + %s2783_s6]] }
  0x6e   : > { %1177 = vmatprep.subr.mxu1 %v710_v51  ;;  %v449_v59 = vadd.f32 %v447_v54, %v444_v44  ;;  %v450_v60 = vadd.f32 %v448_v53, %v445_v45  ;;  %v599_v62 = vsub.f32 %v562_v50, %v2201_v15  ;;  %v474_v61 = vstv %s2351_s11  ;;  %s500_s11 = sadd.s32 23, %s2152_s12  ;;  %s2423_s6 = sld [smem:[#allocation5 + %s283_s22]] }
  0x6f   : > { %1178 = vmatpush1.msra.mxu1 %v709_v46  ;;  %v648_v63 = vand.u32 2147483647, %v616_v55  ;;  %v647_v0 = vand.u32 2147483647, %v615_v56  ;;  %v632_v2 = vand.u32 2147483647, %v600_v58  ;;  %v475_v3 = vmul.f32 %v474_v61, %v2221_v23 }
  0x70   : > { %1839 = vmatmul.mubr.msk.f32.gmra.mxu0 %vm911_vm0, %v2331_v6  ;;  %1179 = vmatprep.subr.mxu1 %v694_v52  ;;  %v452_v4 = vadd.f32 %v451_v57, %v449_v59  ;;  %v453_v5 = vadd.f32 %v451_v57, %v450_v60  ;;  %v631_v7 = vand.u32 2147483647, %v599_v62  ;;  %v476_v9 = vmul.f32 %v474_v61, %v2229_v26  ;;  %s316_s22 = sld [smem:[#allocation5 + %s310_s14]] }
  0x71   : > { %1290 = vmatprep.mubr.f32.mxu0 %v2015_v1  ;;  %1180 = vmatpush1.msra.mxu1 %v693_v47  ;;  %v680_v10 = vsub.f32 1.0, %v648_v63  ;;  %v679_v13 = vsub.f32 1.0, %v647_v0  ;;  %v664_v14 = vsub.f32 1.0, %v632_v2  ;;  %v477_v16 = vstv %s2360_s29  ;;  %s2411_s29 = sld [smem:[#allocation2 + %s500_s11]] }
  0x72   : > { %1840 = vmatmul.mubr.msk.f32.vlgmr.msra.gmra.mxu1 %vm911_vm0, %v2303_v49  ;;  %v574_v17 = vrot.slane %v453_v5, %v2219_v22  ;;  %v570_v18 = vrot.slane %v452_v4, %v2219_v22  ;;  %v663_v19 = vsub.f32 1.0, %v631_v7  ;;  %v478_v20 = vmul.f32 %v477_v16, %v2188_v11  ;;  %s347_s14 = sld [smem:[#allocation5 + %s341_s5]] }
  0x73   : > { %v712_v24 = vmax.f32 %v680_v10, 0.0  ;;  %v711_v25 = vmax.f32 %v679_v13, 0.0  ;;  %1219 = vmatprep.mubr.f32.mxu1 %v2015_v1  ;;  %v696_v28 = vmax.f32 %v664_v14, 0.0  ;;  %v479_v29 = vmul.f32 %v477_v16, %v2191_v12  ;;  %s2502_s5 = sld [smem:[#allocation5 + %s376_s28]] }
  0x74   : > { %v618_v30 = vsub.f32 %v574_v17, %v2231_v27  ;;  %v617_v31 = vsub.f32 %v570_v18, %v2231_v27  ;;  %v695_v32 = vmax.f32 %v663_v19, 0.0  ;;  %v602_v34 = vsub.f32 %v574_v17, %v2201_v15  ;;  %s2530_s28 = sld [smem:[#allocation5 + %s434_s25]]  ;;  %s2796_s25 = sadd.s32 14, %s2152_s12 }
  0x75   : > { %1254 = vmatprep.subr.mxu0 %v712_v24  ;;  %v601_v35 = vsub.f32 %v570_v18, %v2201_v15  ;;  %v480_v36 = vadd.f32 %v478_v20, %v475_v3  ;;  %v481_v37 = vadd.f32 %v479_v29, %v476_v9  ;;  %v482_v38 = vstv %s2379_s9  ;;  %s2795_s9 = sadd.s32 16, %s2152_s12 }
  0x76   : > { %1255 = vmatpush1.msra.mxu0 %v711_v25  ;;  %v650_v39 = vand.u32 2147483647, %v618_v30  ;;  %v649_v40 = vand.u32 2147483647, %v617_v31  ;;  %1841 = vmatmul.mubr.msk.f32.gmra.mxu1 %vm911_vm0, %v2331_v6  ;;  %v634_v41 = vand.u32 2147483647, %v602_v34  ;;  %v505_v42 = vstv %s2385_s24 }
  0x77   : > { %1256 = vmatprep.subr.mxu0 %v696_v28  ;;  %v633_v43 = vand.u32 2147483647, %v601_v35  ;;  %1367 = vmatprep.mubr.f32.mxu1 %v2015_v1  ;;  %v483_v44 = vadd.f32 %v482_v38, %v480_v36  ;;  %v484_v45 = vadd.f32 %v482_v38, %v481_v37  ;;  %v506_v46 = vmul.f32 %v505_v42, %v2221_v23  ;;  %s2495_s24 = sld [smem:[#allocation5 + %s345_s8]] }
  0x78   : > { %v682_v47 = vsub.f32 1.0, %v650_v39  ;;  %v681_v48 = vsub.f32 1.0, %v649_v40  ;;  %1257 = vmatpush1.msra.mxu0 %v695_v32  ;;  %v666_v50 = vsub.f32 1.0, %v634_v41  ;;  %v507_v51 = vmul.f32 %v505_v42, %v2229_v26 }
  0x79   : > { %v665_v52 = vsub.f32 1.0, %v633_v43  ;;  %1842 = vmatmul.mubr.msk.f32.vlgmr.msra.gmra.mxu0 %vm911_vm0, %v2303_v49  ;;  %v582_v54 = vrot.slane %v484_v45, %v2219_v22  ;;  %v578_v53 = vrot.slane %v483_v44, %v2219_v22  ;;  %v508_v55 = vstv %s2396_s26  ;;  %s2534_s26 = sld [smem:[#allocation5 + %s2795_s9]] }
  0x7a   : > { %v714_v56 = vmax.f32 %v682_v47, 0.0  ;;  %v713_v57 = vmax.f32 %v681_v48, 0.0  ;;  %v698_v58 = vmax.f32 %v666_v50, 0.0  ;;  %v509_v59 = vmul.f32 %v508_v55, %v2188_v11  ;;  %1296 = vmatprep.mubr.f32.mxu0 %v2015_v1 }
  0x7b   : > { %v697_v60 = vmax.f32 %v665_v52, 0.0  ;;  %v620_v62 = vsub.f32 %v582_v54, %v2231_v27  ;;  %v619_v61 = vsub.f32 %v578_v53, %v2231_v27  ;;  %v510_v63 = vmul.f32 %v508_v55, %v2191_v12 }
  0x7c   : > { %1331 = vmatprep.subr.mxu1 %v714_v56  ;;  %v511_v0 = vadd.f32 %v509_v59, %v506_v46  ;;  %v513_v2 = vstv %s2411_s29  ;;  %v604_v3 = vsub.f32 %v582_v54, %v2201_v15  ;;  %v603_v4 = vsub.f32 %v578_v53, %v2201_v15  ;;  %s2541_s29 = sld [smem:[#allocation5 + %s2796_s25]] }
  0x7d   : > { %1332 = vmatpush1.msra.mxu1 %v713_v57  ;;  %v652_v5 = vand.u32 2147483647, %v620_v62  ;;  %v651_v7 = vand.u32 2147483647, %v619_v61  ;;  %v512_v9 = vadd.f32 %v510_v63, %v507_v51  ;;  %1843 = vmatmul.mubr.msk.f32.gmra.mxu0 %vm911_vm0, %v2331_v6  ;;  %v299_v10 = vstv %s2416_s15  ;;  %s318_s15 = sld [smem:[#allocation5 + %s314_s30]] }
  0x7e   : > { %1333 = vmatprep.subr.mxu1 %v698_v58  ;;  %v514_v13 = vadd.f32 %v513_v2, %v511_v0  ;;  %v636_v14 = vand.u32 2147483647, %v604_v3  ;;  %v635_v16 = vand.u32 2147483647, %v603_v4  ;;  %1444 = vmatprep.mubr.f32.mxu0 %v2015_v1  ;;  %v300_v17 = vmul.f32 %v299_v10, %v2221_v23  ;;  %s379_s30 = sld [smem:[#allocation5 + %s374_s13]] }
  0x7f   : > { %1334 = vmatpush1.msra.mxu1 %v697_v60  ;;  %v684_v18 = vsub.f32 1.0, %v652_v5  ;;  %v683_v19 = vsub.f32 1.0, %v651_v7  ;;  %v515_v20 = vadd.f32 %v513_v2, %v512_v9  ;;  %v307_v24 = vstv %s2423_s6  ;;  %s317_s6 = sld [smem:[#allocation5 + %s312_s21]] }
  0x80   : > { %1844 = vmatmul.mubr.msk.f32.vlgmr.msra.gmra.mxu1 %vm911_vm0, %v2303_v49  ;;  %v586_v25 = vrot.slane %v514_v13, %v2219_v22  ;;  %v668_v28 = vsub.f32 1.0, %v636_v14  ;;  %v667_v29 = vsub.f32 1.0, %v635_v16  ;;  %v305_v30 = vadd.f32 %v2245_v33, %v300_v17  ;;  %s348_s21 = sld [smem:[#allocation5 + %s343_s7]]  ;;  %s2793_s7 = sadd.s32 12, %s2152_s12 }
  0x81   : > { %v716_v31 = vmax.f32 %v684_v18, 0.0  ;;  %v715_v32 = vmax.f32 %v683_v19, 0.0  ;;  %v590_v34 = vrot.slane %v515_v20, %v2219_v22  ;;  %1373 = vmatprep.mubr.f32.mxu1 %v2015_v1  ;;  %v330_v53 = vstv %s316_s22  ;;  %s2513_s8 = sld [smem:[#allocation5 + %s2793_s7]]  ;;  %s2797_s22 = sadd.s32 17, %s2152_s12 }
  0x82   : > { %v621_v35 = vsub.f32 %v586_v25, %v2231_v27  ;;  %v700_v36 = vmax.f32 %v668_v28, 0.0  ;;  %v699_v37 = vmax.f32 %v667_v29, 0.0  ;;  %v605_v38 = vsub.f32 %v586_v25, %v2201_v15  ;;  %s2520_s13 = sld [smem:[#allocation5 + %s2794_s10]] }
  0x83   : > { %1408 = vmatprep.subr.mxu0 %v716_v31  ;;  %v622_v39 = vsub.f32 %v590_v34, %v2231_v27  ;;  %v606_v40 = vsub.f32 %v590_v34, %v2201_v15  ;;  %v308_v41 = vadd.f32 %v307_v24, %v305_v30  ;;  %v301_v56 = vmul.f32 %v299_v10, %v2229_v26 }
  0x84   : > { %1409 = vmatpush1.msra.mxu0 %v715_v32  ;;  %v653_v33 = vand.u32 2147483647, %v621_v35  ;;  %1845 = vmatmul.mubr.msk.f32.gmra.mxu1 %vm911_vm0, %v2331_v6  ;;  %v637_v42 = vand.u32 2147483647, %v605_v38  ;;  %v338_v57 = vstv %s318_s15  ;;  %v332_v58 = vmul.f32 %v330_v53, %v2229_v26  ;;  %s2798_s15 = sadd.s32 18, %s2152_s12 }
  0x85   : > { %v654_v43 = vand.u32 2147483647, %v622_v39  ;;  %1410 = vmatprep.subr.mxu0 %v700_v36  ;;  %v638_v44 = vand.u32 2147483647, %v606_v40  ;;  %1521 = vmatprep.mubr.f32.mxu1 %v2015_v1  ;;  %v333_v55 = vstv %s317_s6  ;;  %v361_v3 = vstv %s347_s14  ;;  %s2559_s6 = sld [smem:[#allocation5 + %s2797_s22]] }
  0x86   : > { %v685_v45 = vsub.f32 1.0, %v653_v33  ;;  %1411 = vmatpush1.msra.mxu0 %v699_v37  ;;  %v669_v46 = vsub.f32 1.0, %v637_v42  ;;  %v335_v59 = vmul.f32 %v333_v55, %v2191_v12  ;;  %v364_v4 = vstv %s348_s21  ;;  %s2573_s14 = sld [smem:[#allocation5 + %s2798_s15]]  ;;  %s2799_s21 = sadd.s32 19, %s2152_s12 }
  0x87   : > { %v686_v47 = vsub.f32 1.0, %v654_v43  ;;  %v670_v48 = vsub.f32 1.0, %v638_v44  ;;  %1846 = vmatmul.mubr.msk.f32.vlgmr.msra.gmra.mxu0 %vm911_vm0, %v2303_v49  ;;  %v362_v5 = vmul.f32 %v361_v3, %v2221_v23  ;;  %v365_v7 = vmul.f32 %v364_v4, %v2188_v11 }
  0x88   : > { %v717_v50 = vmax.f32 %v685_v45, 0.0  ;;  %1450 = vmatprep.mubr.f32.mxu0 %v2015_v1  ;;  %v701_v54 = vmax.f32 %v669_v46, 0.0  ;;  %v337_v61 = vadd.f32 %v335_v59, %v332_v58  ;;  %v392_v10 = vstv %s378_s18  ;;  %s2579_s18 = sld [smem:[#allocation5 + %s2799_s21]] }
  0x89   : > { %v718_v51 = vmax.f32 %v686_v47, 0.0  ;;  %v702_v52 = vmax.f32 %v670_v48, 0.0  ;;  %v395_v13 = vstv %s379_s30  ;;  %v367_v18 = vadd.f32 %v365_v7, %v362_v5  ;;  %s2591_s30 = sld [smem:[#allocation5 + %s496_s27]]  ;;  %s2801_s27 = sadd.s32 20, %s2152_s12 }
  0x8a   : > { %v340_v2 = vadd.f32 %v338_v57, %v337_v61  ;;  %v393_v19 = vmul.f32 %v392_v10, %v2221_v23  ;;  %v396_v20 = vmul.f32 %v395_v13, %v2188_v11  ;;  %v369_v28 = vstv %s2495_s24  ;;  %s2800_s24 = sadd.s32 22, %s2152_s12  ;;  %s2602_s7 = sld [smem:[#allocation5 + %s2801_s27]] }
  0x8b   : > { %1485 = vmatprep.subr.mxu1 %v718_v51  ;;  %1847 = vmatmul.mubr.msk.f32.gmra.mxu0 %vm911_vm0, %v2331_v6  ;;  %v363_v30 = vmul.f32 %v361_v3, %v2229_v26  ;;  %v366_v31 = vmul.f32 %v364_v4, %v2191_v12  ;;  %v394_v35 = vmul.f32 %v392_v10, %v2229_v26  ;;  %v400_v33 = vstv %s2502_s5  ;;  %s2595_s5 = sld [smem:[#allocation5 + %s2800_s24]]  ;;  %s1831_s12 = sshll.u32 %s2807_s19, 1 }
  0x8c   : > { %1486 = vmatpush1.msra.mxu1 %v717_v50  ;;  %v734_v17 = vrot.slane %v340_v2, %v2219_v22  ;;  %v397_v36 = vmul.f32 %v395_v13, %v2191_v12  ;;  %v370_v38 = vadd.f32 %v369_v28, %v367_v18  ;;  %v398_v39 = vadd.f32 %v396_v20, %v393_v19 }
  0x8d   : > { %1487 = vmatprep.subr.mxu1 %v702_v52  ;;  %v368_v43 = vadd.f32 %v366_v31, %v363_v30  ;;  %v454_v4 = vstv %s2530_s28  ;;  %v457_v5 = vstv %s2534_s26  ;;  %v431_v31 = vstv %s2541_s29  ;;  %s1832_s28 = sshll.u32 %s2807_s19, 3 }
  0x8e   : > { %1488 = vmatpush1.msra.mxu1 %v701_v54  ;;  %v786_v34 = vsub.f32 %v734_v17, %v2201_v15  ;;  %v399_v46 = vadd.f32 %v397_v36, %v394_v35  ;;  %v738_v48 = vrot.slane %v370_v38, %v2219_v22  ;;  %v401_v50 = vadd.f32 %v400_v33, %v398_v39  ;;  %s255_s25 = scalar_lea.vmem %s2771_s4, %s1832_s28 }
  0x8f   : > { %1848 = vmatmul.mubr.msk.f32.vlgmr.msra.gmra.mxu1 %vm911_vm0, %v2303_v49  ;;  %v331_v49 = vmul.f32 %v330_v53, %v2221_v23  ;;  %v371_v53 = vadd.f32 %v369_v28, %v368_v43  ;;  %v802_v59 = vsub.f32 %v734_v17, %v2231_v27  ;;  %v459_v43 = vmul.f32 %v457_v5, %v2191_v12 }
  0x90   : > { %1527 = vmatprep.mubr.f32.mxu1 %v2015_v1  ;;  %v334_v1 = vmul.f32 %v333_v55, %v2188_v11  ;;  %v818_v45 = vand.u32 2147483647, %v786_v34  ;;  %v423_v55 = vstv %s2513_s8  ;;  %s2609_s8 = sld [smem:[#allocation5 + %s500_s11]] }
  0x91   : > { %v742_v3 = vrot.slane %v371_v53, %v2219_v22  ;;  %v425_v35 = vmul.f32 %v423_v55, %v2229_v26 }
  0x92   : > { %v336_v60 = vadd.f32 %v334_v1, %v331_v49  ;;  %v850_v1 = vsub.f32 1.0, %v818_v45 }
  0x93   : > { %1849 = vmatmul.mubr.msk.f32.gmra.mxu1 %vm911_vm0, %v2331_v6  ;;  %v304_v6 = vmul.f32 %v302_v21, %v2191_v12  ;;  %v722_v21 = vrot.slane %v308_v41, %v2219_v22  ;;  %v788_v28 = vsub.f32 %v742_v3, %v2201_v15  ;;  %v804_v30 = vsub.f32 %v742_v3, %v2231_v27 }
  0x94   : > { %v339_v63 = vadd.f32 %v338_v57, %v336_v60  ;;  %v402_v57 = vadd.f32 %v400_v33, %v399_v46  ;;  %v787_v60 = vsub.f32 %v738_v48, %v2201_v15 }
  0x95   : > { %v306_v62 = vadd.f32 %v304_v6, %v301_v56  ;;  %v783_v9 = vsub.f32 %v722_v21, %v2201_v15  ;;  %v799_v25 = vsub.f32 %v722_v21, %v2231_v27  ;;  %v426_v56 = vstv %s2520_s13  ;;  %s251_s13 = scalar_lea.vmem %s2770_s3, %s1831_s12 }
  0x96   : > { %v730_v14 = vrot.slane %v339_v63, %v2219_v22  ;;  %v803_v63 = vsub.f32 %v738_v48, %v2231_v27  ;;  %v427_v2 = vmul.f32 %v426_v56, %v2188_v11  ;;  %v750_v13 = vrot.slane %v402_v57, %v2219_v22 }
  0x97   : > { %v309_v0 = vadd.f32 %v307_v24, %v306_v62  ;;  %v815_v24 = vand.u32 2147483647, %v783_v9  ;;  %v831_v41 = vand.u32 2147483647, %v799_v25  ;;  %v746_v62 = vrot.slane %v401_v50, %v2219_v22 }
  0x98   : > { %v785_v29 = vsub.f32 %v730_v14, %v2201_v15  ;;  %v801_v37 = vsub.f32 %v730_v14, %v2231_v27  ;;  %v2565_v9 = vmax.f32 %v850_v1, 0.0  ;;  %v819_v17 = vand.u32 2147483647, %v787_v60 }
  0x99   : > { %v726_v16 = vrot.slane %v309_v0, %v2219_v22  ;;  %v847_v40 = vsub.f32 1.0, %v815_v24  ;;  %v863_v52 = vsub.f32 1.0, %v831_v41  ;;  %v424_v0 = vmul.f32 %v423_v55, %v2221_v23 }
  0x9a   : > { %v817_v42 = vand.u32 2147483647, %v785_v29  ;;  %v833_v47 = vand.u32 2147483647, %v801_v37  ;;  %v789_v18 = vsub.f32 %v746_v62, %v2201_v15  ;;  %v835_v19 = vand.u32 2147483647, %v803_v63 }
  0x9b   : > { %v784_v32 = vsub.f32 %v726_v16, %v2201_v15  ;;  %v2537_v51 = vmax.f32 %v847_v40, 0.0  ;;  %v800_v6 = vsub.f32 %v726_v16, %v2231_v27  ;;  %v2549_v61 = vmax.f32 %v863_v52, 0.0 }
  0x9c   : > { %v849_v54 = vsub.f32 1.0, %v817_v42  ;;  %v865_v58 = vsub.f32 1.0, %v833_v47  ;;  %v834_v16 = vand.u32 2147483647, %v802_v59  ;;  %v429_v20 = vadd.f32 %v427_v2, %v424_v0 }
  0x9d   : > { %v816_v44 = vand.u32 2147483647, %v784_v32  ;;  %v832_v10 = vand.u32 2147483647, %v800_v6  ;;  %v455_v24 = vmul.f32 %v454_v4, %v2221_v23  ;;  %v458_v25 = vmul.f32 %v457_v5, %v2188_v11 }
  0x9e   : > { %v2554_v21 = vmax.f32 %v849_v54, 0.0  ;;  %v2568_v14 = vmax.f32 %v865_v58, 0.0  ;;  %v805_v29 = vsub.f32 %v746_v62, %v2231_v27  ;;  %v790_v32 = vsub.f32 %v750_v13, %v2201_v15 }
  0x9f   : > { %v848_v49 = vsub.f32 1.0, %v816_v44  ;;  %v806_v34 = vsub.f32 %v750_v13, %v2231_v27  ;;  %v428_v36 = vmul.f32 %v426_v56, %v2191_v12  ;;  %v864_v37 = vsub.f32 1.0, %v832_v10 }
  0xa0   : > { %v866_v38 = vsub.f32 1.0, %v834_v16  ;;  %v851_v39 = vsub.f32 1.0, %v819_v17  ;;  %v821_v40 = vand.u32 2147483647, %v789_v18  ;;  %v432_v41 = vadd.f32 %v431_v31, %v429_v20 }
  0xa1   : > { %v2563_v7 = vmax.f32 %v848_v49, 0.0  ;;  %v460_v33 = vadd.f32 %v458_v25, %v455_v24  ;;  %v456_v42 = vmul.f32 %v454_v4, %v2229_v26  ;;  %v820_v44 = vand.u32 2147483647, %v788_v28 }
  0xa2   : > { %v837_v45 = vand.u32 2147483647, %v805_v29  ;;  %v836_v46 = vand.u32 2147483647, %v804_v30  ;;  %v462_v47 = vstv %s2559_s6  ;;  %v822_v48 = vand.u32 2147483647, %v790_v32 }
  0xa3   : > { %v867_v50 = vsub.f32 1.0, %v835_v19  ;;  %v838_v52 = vand.u32 2147483647, %v806_v34  ;;  %v430_v54 = vadd.f32 %v428_v36, %v425_v35  ;;  %v896_v53 = vmax.f32 %v864_v37, 0.0 }
  0xa4   : > { %v898_v55 = vmax.f32 %v866_v38, 0.0  ;;  %v2604_v56 = vmax.f32 %v851_v39, 0.0  ;;  %v485_v49 = vstv %s2573_s14  ;;  %v754_v1 = vrot.slane %v432_v41, %v2219_v22 }
  0xa5   : > { %v463_v6 = vadd.f32 %v462_v47, %v460_v33  ;;  %v461_v57 = vadd.f32 %v459_v43, %v456_v42  ;;  %v488_v58 = vstv %s2579_s18  ;;  %v853_v59 = vsub.f32 1.0, %v821_v40 }
  0xa6   : > { %v852_v60 = vsub.f32 1.0, %v820_v44  ;;  %v869_v62 = vsub.f32 1.0, %v837_v45  ;;  %v868_v63 = vsub.f32 1.0, %v836_v46  ;;  %v854_v0 = vsub.f32 1.0, %v822_v48 }
  0xa7   : > { %v2613_v2 = vmax.f32 %v867_v50, 0.0  ;;  %v870_v3 = vsub.f32 1.0, %v838_v52  ;;  %v433_v4 = vadd.f32 %v431_v31, %v430_v54  ;;  %v486_v5 = vmul.f32 %v485_v49, %v2221_v23 }
  0xa8   : > { %v489_v10 = vmul.f32 %v488_v58, %v2188_v11  ;;  %v516_v13 = vstv %s2591_s30  ;;  %v519_v16 = vstv %s2595_s5  ;;  %v791_v19 = vsub.f32 %v754_v1, %v2201_v15 }
  0xa9   : > { %v762_v20 = vrot.slane %v463_v6, %v2219_v22  ;;  %v464_v24 = vadd.f32 %v462_v47, %v461_v57  ;;  %v807_v25 = vsub.f32 %v754_v1, %v2231_v27  ;;  %v2626_v28 = vmax.f32 %v853_v59, 0.0 }
  0xaa   : > { %v2628_v29 = vmax.f32 %v852_v60, 0.0  ;;  %v2630_v30 = vmax.f32 %v869_v62, 0.0  ;;  %v2632_v31 = vmax.f32 %v868_v63, 0.0  ;;  %v2634_v35 = vmax.f32 %v854_v0, 0.0 }
  0xab   : > { %v2636_v36 = vmax.f32 %v870_v3, 0.0  ;;  %v758_v37 = vrot.slane %v433_v4, %v2219_v22  ;;  %v493_v38 = vstv %s2602_s7  ;;  %v491_v39 = vadd.f32 %v489_v10, %v486_v5 }
  0xac   : > { %v2643_v40 = vmul.f32 %v516_v13, %v2221_v23  ;;  %v520_v41 = vmul.f32 %v519_v16, %v2188_v11  ;;  %v524_v33 = vstv %s2609_s8  ;;  %v823_v44 = vand.u32 2147483647, %v791_v19 }
  0xad   : > { %v793_v45 = vsub.f32 %v762_v20, %v2201_v15  ;;  %v2651_v46 = vrot.slane %v464_v24, %v2219_v22  ;;  %v839_v47 = vand.u32 2147483647, %v807_v25  ;;  %v792_v57 = vsub.f32 %v758_v37, %v2201_v15 }
  0xae   : > { %v809_v59 = vsub.f32 %v762_v20, %v2231_v27  ;;  %v855_v63 = vsub.f32 1.0, %v823_v44 }
  0xaf   : > { %v794_v10 = vsub.f32 %v2651_v46, %v2201_v15 }
 0x124   : > { %v984_v17 = vpop.f32.mrf.mxu0  ;;  %v1061_v18 = vpop.f32.mrf.mxu1 }
 0x125   : > { %v1534_v48 = vmul.f32 %v984_v17, %v2537_v51  ;;  %v1536_v50 = vmul.f32 %v1061_v18, %v2554_v21  ;;  %v871_v17 = vsub.f32 1.0, %v839_v47 }
 0x126   : > { %v986_v32 = vpop.f32.mrf.mxu0  ;;  %v1063_v34 = vpop.f32.mrf.mxu1 }
 0x127   : > { %v1535_v11 = vmul.f32 %v986_v32, %v2563_v7  ;;  %v1537_v54 = vmul.f32 %v1063_v34, %v2565_v9  ;;  %v494_v7 = vadd.f32 %v493_v38, %v491_v39  ;;  %v824_v32 = vand.u32 2147483647, %v792_v57 }
 0x128   : > { %v990_v42 = vpop.f32.mrf.mxu0  ;;  %v1067_v43 = vpop.f32.mrf.mxu1  ;;  %v841_v34 = vand.u32 2147483647, %v809_v59  ;;  %v810_v39 = vsub.f32 %v2651_v46, %v2231_v27  ;;  %v903_v57 = vmax.f32 %v871_v17, 0.0  ;;  %v522_v59 = vadd.f32 %v520_v41, %v2643_v40 }
 0x129   : > { %v1550_v23 = vmul.f32 %v990_v42, %v2549_v61  ;;  %v1552_v52 = vmul.f32 %v1067_v43, %v2568_v14  ;;  %v2661_v61 = vand.u32 2147483647, %v793_v45  ;;  %v808_v14 = vsub.f32 %v758_v37, %v2231_v27 }
 0x12a   : > { %v992_v1 = vpop.f32.mrf.mxu0  ;;  %v1069_v6 = vpop.f32.mrf.mxu1  ;;  %v2682_v47 = vrot.slane %v494_v7, %v2219_v22  ;;  %v518_v7 = vmul.f32 %v516_v13, %v2229_v26 }
 0x12b   : > { %v1566_v60 = vadd.f32 %v1550_v23, %v1534_v48  ;;  %v1580_v51 = vadd.f32 %v1552_v52, %v1536_v50  ;;  %v1551_v21 = vmul.f32 %v992_v1, %v896_v53  ;;  %v1553_v62 = vmul.f32 %v1069_v6, %v898_v55 }
 0x12c   : > { %v1138_v5 = vpop.f32.mrf.mxu0  ;;  %v487_v53 = vmul.f32 %v485_v49, %v2229_v26  ;;  %v490_v55 = vmul.f32 %v488_v58, %v2191_v12  ;;  %v840_v37 = vand.u32 2147483647, %v808_v14  ;;  %v2678_v49 = vmax.f32 %v855_v63, 0.0 }
 0x12d   : > { %v1567_v9 = vrot.slane %v1566_v60, 4  ;;  %v1581_v0 = vrot.slane %v1580_v51, 4  ;;  %v1573_v3 = vadd.f32 %v1551_v21, %v1535_v11  ;;  %v1587_v4 = vadd.f32 %v1553_v62, %v1537_v54 }
 0x12e   : > { %v2674_v25 = vpop.f32.mrf.mxu0  ;;  %v857_v58 = vsub.f32 1.0, %v2661_v61  ;;  %v492_v48 = vadd.f32 %v490_v55, %v487_v53  ;;  %v856_v1 = vsub.f32 1.0, %v824_v32  ;;  %v826_v6 = vand.u32 2147483647, %v794_v10 }
 0x12f   : > { %v1568_v18 = vadd.f32 %v1567_v9, %v1566_v60  ;;  %v1582_v19 = vadd.f32 %v1581_v0, %v1580_v51  ;;  %v1574_v20 = vrot.slane %v1573_v3, 4  ;;  %v1588_v24 = vrot.slane %v1587_v4, 4 }
 0x130   : > { %v1144_v46 = vpop.f32.mrf.mxu0  ;;  %v795_v61 = vsub.f32 %v2682_v47, %v2201_v15  ;;  %v495_v14 = vadd.f32 %v493_v38, %v492_v48  ;;  %v521_v9 = vmul.f32 %v519_v16, %v2191_v12  ;;  %v873_v53 = vsub.f32 1.0, %v841_v34 }
 0x131   : > { %v1569_v42 = vrot.slane %v1568_v18, 2  ;;  %v1583_v43 = vrot.slane %v1582_v19, 2  ;;  %v1575_v44 = vadd.f32 %v1574_v20, %v1573_v3  ;;  %v1589_v45 = vadd.f32 %v1588_v24, %v1587_v4 }
 0x132   : > { %v1215_v54 = vpop.f32.mrf.mxu1  ;;  %v1146_v4 = vpop.f32.mrf.mxu0  ;;  %v1554_v10 = vmul.f32 %v1144_v46, %v2613_v2  ;;  %v872_v55 = vsub.f32 1.0, %v840_v37  ;;  %v525_v26 = vadd.f32 %v524_v33, %v522_v59  ;;  %v1538_v12 = vmul.f32 %v1138_v5, %v2604_v56 }
 0x133   : > { %v1570_v50 = vadd.f32 %v1569_v42, %v1568_v18  ;;  %v1584_v23 = vadd.f32 %v1583_v43, %v1582_v19  ;;  %v1576_v52 = vrot.slane %v1575_v44, 2  ;;  %v1590_v11 = vrot.slane %v1589_v45, 2 }
 0x134   : > { %v1217_v63 = vpop.f32.mrf.mxu1  ;;  %v842_v18 = vand.u32 2147483647, %v810_v39  ;;  %v889_v13 = vmax.f32 %v857_v58, 0.0  ;;  %v774_v16 = vrot.slane %v495_v14, %v2219_v22  ;;  %v523_v24 = vadd.f32 %v521_v9, %v518_v7 }
 0x135   : > { %v1571_v60 = vrot.slane %v1570_v50, 1  ;;  %v1585_v51 = vrot.slane %v1584_v23, 1  ;;  %v1577_v21 = vadd.f32 %v1576_v52, %v1575_v44  ;;  %v1591_v62 = vadd.f32 %v1590_v11, %v1589_v45 }
 0x136   : > { %v1221_v17 = vpop.f32.mrf.mxu1  ;;  %v888_v34 = vmax.f32 %v856_v1, 0.0  ;;  %v858_v37 = vsub.f32 1.0, %v826_v6  ;;  %v827_v39 = vand.u32 2147483647, %v795_v61  ;;  %v1594_v42 = vadd.f32 %v1554_v10, %v1538_v12 }
 0x137   : > { %v1572_v0 = vadd.f32 %v1571_v60, %v1570_v50  ;;  %v1586_v3 = vadd.f32 %v1585_v51, %v1584_v23  ;;  %v1578_v40 = vrot.slane %v1577_v21, 1  ;;  %v1592_v41 = vrot.slane %v1591_v62, 1 }
 0x138   : > { %v1556_v43 = vmul.f32 %v1221_v17, %v2630_v30  ;;  %v1555_v44 = vmul.f32 %v1146_v4, %v2632_v31  ;;  %v1223_v45 = vpop.f32.mrf.mxu1  ;;  %v905_v48 = vmax.f32 %v873_v53, 0.0  ;;  %v904_v5 = vmax.f32 %v872_v55, 0.0 }
 0x139   : > { %v2697_v38 = vsel %vm1678_vm1, %v1572_v0, %v1586_v3  ;;  %v1579_v19 = vadd.f32 %v1578_v40, %v1577_v21  ;;  %v1593_v20 = vadd.f32 %v1592_v41, %v1591_v62  ;;  %v1292_v2 = vpop.f32.mrf.mxu0  ;;  %v874_v58 = vsub.f32 1.0, %v842_v18 }
 0x13a   : > { %v778_v50 = vrot.slane %v525_v26, %v2219_v22  ;;  %v811_v23 = vsub.f32 %v2682_v47, %v2231_v27  ;;  %v1540_v52 = vmul.f32 %v1215_v54, %v2626_v28  ;;  %v1539_v11 = vmul.f32 %v2674_v25, %v2628_v29 }
 0x13b   : > { %v2704_v32 = vsel %vm1678_vm1, %v1579_v19, %v1593_v20  ;;  %v1294_v56 = vpop.f32.mrf.mxu0  ;;  %v796_v46 = vsub.f32 %v774_v16, %v2201_v15  ;;  %v526_v30 = vadd.f32 %v524_v33, %v523_v24  ;;  %v1557_v31 = vmul.f32 %v1223_v45, %v2636_v36 }
 0x13c   : > { %v890_v1 = vmax.f32 %v858_v37, 0.0  ;;  %v859_v59 = vsub.f32 1.0, %v827_v39  ;;  %v812_v60 = vsub.f32 %v774_v16, %v2231_v27  ;;  %v1595_v51 = vrot.slane %v1594_v42, 4 }
 0x13d   : > { %v1298_v6 = vpop.f32.mrf.mxu0  ;;  %v1608_v21 = vadd.f32 %v1556_v43, %v1540_v52  ;;  %v1601_v62 = vadd.f32 %v1555_v44, %v1539_v11  ;;  %v1541_v28 = vmul.f32 %v1217_v63, %v2634_v35  ;;  %v1542_v54 = vmul.f32 %v1292_v2, %v2678_v49 }
 0x13e   : > { %v1558_v47 = vmul.f32 %v1298_v6, %v903_v57  ;;  %v797_v25 = vsub.f32 %v778_v50, %v2201_v15  ;;  %v843_v61 = vand.u32 2147483647, %v811_v23  ;;  %v828_v36 = vand.u32 2147483647, %v796_v46 }
 0x13f   : > { %v1300_v29 = vpop.f32.mrf.mxu0  ;;  %v782_v7 = vrot.slane %v526_v30, %v2219_v22  ;;  %v813_v9 = vsub.f32 %v778_v50, %v2231_v27  ;;  %v1615_v0 = vadd.f32 %v1557_v31, %v1541_v28  ;;  %v1543_v3 = vmul.f32 %v1294_v56, %v888_v34 }
 0x140   : > { %v1369_v33 = vpop.f32.mrf.mxu1  ;;  %v1559_v14 = vmul.f32 %v1300_v29, %v904_v5  ;;  %v1622_v40 = vadd.f32 %v1558_v47, %v1542_v54  ;;  %v906_v41 = vmax.f32 %v874_v58, 0.0  ;;  %v1596_v57 = vadd.f32 %v1595_v51, %v1594_v42 }
 0x141   : > { %v1609_v4 = vrot.slane %v1608_v21, 4  ;;  %v1602_v35 = vrot.slane %v1601_v62, 4  ;;  %v844_v49 = vand.u32 2147483647, %v812_v60  ;;  %v891_v17 = vmax.f32 %v859_v59, 0.0 }
 0x142   : > { %v1371_v63 = vpop.f32.mrf.mxu1  ;;  %v1629_v10 = vadd.f32 %v1559_v14, %v1543_v3  ;;  %v829_v53 = vand.u32 2147483647, %v797_v25  ;;  %v875_v55 = vsub.f32 1.0, %v843_v61  ;;  %v860_v19 = vsub.f32 1.0, %v828_v36 }
 0x143   : > { %v798_v20 = vsub.f32 %v782_v7, %v2201_v15  ;;  %v845_v26 = vand.u32 2147483647, %v813_v9  ;;  %v814_v12 = vsub.f32 %v782_v7, %v2231_v27  ;;  %v1616_v16 = vrot.slane %v1615_v0, 4 }
 0x144   : > { %v1375_v18 = vpop.f32.mrf.mxu1  ;;  %v1544_v24 = vmul.f32 %v1369_v33, %v889_v13  ;;  %v1623_v2 = vrot.slane %v1622_v40, 4  ;;  %v1597_v37 = vrot.slane %v1596_v57, 2  ;;  %v1610_v39 = vadd.f32 %v1609_v4, %v1608_v21 }
 0x145   : > { %v1560_v34 = vmul.f32 %v1375_v18, %v905_v48  ;;  %v1603_v42 = vadd.f32 %v1602_v35, %v1601_v62  ;;  %v876_v44 = vsub.f32 1.0, %v844_v49  ;;  %v1545_v45 = vmul.f32 %v1371_v63, %v890_v1 }
 0x146   : > { %v1377_v43 = vpop.f32.mrf.mxu1  ;;  %v1630_v5 = vrot.slane %v1629_v10, 4  ;;  %v861_v23 = vsub.f32 1.0, %v829_v53  ;;  %v830_v52 = vand.u32 2147483647, %v798_v20  ;;  %v907_v15 = vmax.f32 %v875_v55, 0.0 }
 0x147   : > { %v1636_v56 = vadd.f32 %v1560_v34, %v1544_v24  ;;  %v1561_v58 = vmul.f32 %v1377_v43, %v906_v41  ;;  %v1446_v50 = vpop.f32.mrf.mxu0  ;;  %v846_v11 = vand.u32 2147483647, %v814_v12  ;;  %v1617_v46 = vadd.f32 %v1616_v16, %v1615_v0 }
 0x148   : > { %v1624_v27 = vadd.f32 %v1623_v2, %v1622_v40  ;;  %v1598_v48 = vadd.f32 %v1597_v37, %v1596_v57  ;;  %v1604_v6 = vrot.slane %v1603_v42, 2  ;;  %v892_v59 = vmax.f32 %v860_v19, 0.0 }
 0x149   : > { %v1637_v30 = vrot.slane %v1636_v56, 4  ;;  %v1643_v13 = vadd.f32 %v1561_v58, %v1545_v45  ;;  %v1448_v31 = vpop.f32.mrf.mxu0  ;;  %v908_v60 = vmax.f32 %v876_v44, 0.0  ;;  %v1611_v51 = vrot.slane %v1610_v39, 2 }
 0x14a   : > { %v1631_v1 = vadd.f32 %v1630_v5, %v1629_v10  ;;  %v1546_v28 = vmul.f32 %v1446_v50, %v891_v17  ;;  %v862_v54 = vsub.f32 1.0, %v830_v52  ;;  %v877_v25 = vsub.f32 1.0, %v845_v26 }
 0x14b   : > { %v1638_v21 = vadd.f32 %v1637_v30, %v1636_v56  ;;  %v1644_v62 = vrot.slane %v1643_v13, 4  ;;  %v1452_v47 = vpop.f32.mrf.mxu0  ;;  %v1618_v61 = vrot.slane %v1617_v46, 2  ;;  %v1625_v33 = vrot.slane %v1624_v27, 2 }
 0x14c   : > { %v1562_v29 = vmul.f32 %v1452_v47, %v907_v15  ;;  %v878_v7 = vsub.f32 1.0, %v846_v11  ;;  %v1599_v9 = vrot.slane %v1598_v48, 1  ;;  %v1547_v0 = vmul.f32 %v1448_v31, %v892_v59 }
 0x14d   : > { %v1645_v14 = vadd.f32 %v1644_v62, %v1643_v13  ;;  %v1454_v36 = vpop.f32.mrf.mxu0  ;;  %v1612_v41 = vadd.f32 %v1611_v51, %v1610_v39  ;;  %v1605_v57 = vadd.f32 %v1604_v6, %v1603_v42  ;;  %v1639_v4 = vrot.slane %v1638_v21, 2 }
 0x14e   : > { %v1650_v3 = vadd.f32 %v1562_v29, %v1546_v28  ;;  %v1563_v40 = vmul.f32 %v1454_v36, %v908_v60  ;;  %v1632_v35 = vrot.slane %v1631_v1, 2  ;;  %v893_v49 = vmax.f32 %v861_v23, 0.0 }
 0x14f   : > { %v1523_v63 = vpop.f32.mrf.mxu1  ;;  %v909_v17 = vmax.f32 %v877_v25, 0.0  ;;  %v1619_v55 = vadd.f32 %v1618_v61, %v1617_v46  ;;  %v1626_v18 = vadd.f32 %v1625_v33, %v1624_v27  ;;  %v1646_v19 = vrot.slane %v1645_v14, 2 }
 0x150   : > { %v1651_v10 = vrot.slane %v1650_v3, 4  ;;  %v1657_v53 = vadd.f32 %v1563_v40, %v1547_v0  ;;  %v894_v20 = vmax.f32 %v862_v54, 0.0  ;;  %v1600_v12 = vadd.f32 %v1599_v9, %v1598_v48 }
 0x151   : > { %v1525_v26 = vpop.f32.mrf.mxu1  ;;  %v910_v2 = vmax.f32 %v878_v7, 0.0  ;;  %v1613_v34 = vrot.slane %v1612_v41, 1  ;;  %v1606_v37 = vrot.slane %v1605_v57, 1  ;;  %v1640_v39 = vadd.f32 %v1639_v4, %v1638_v21 }
 0x152   : > { %v1652_v16 = vadd.f32 %v1651_v10, %v1650_v3  ;;  %v1658_v24 = vrot.slane %v1657_v53, 4  ;;  %v1633_v42 = vadd.f32 %v1632_v35, %v1631_v1  ;;  %v1548_v44 = vmul.f32 %v1523_v63, %v893_v49 }
 0x153   : > { %v1529_v43 = vpop.f32.mrf.mxu1  ;;  %v1620_v58 = vrot.slane %v1619_v55, 1  ;;  %v1627_v50 = vrot.slane %v1626_v18, 1  ;;  %v1647_v23 = vadd.f32 %v1646_v19, %v1645_v14  ;;  %v1549_v52 = vmul.f32 %v1525_v26, %v894_v20 }
 0x154   : > { %v1653_v45 = vrot.slane %v1652_v16, 2  ;;  %v1564_v56 = vmul.f32 %v1529_v43, %v909_v17  ;;  %v1659_v5 = vadd.f32 %v1658_v24, %v1657_v53  ;;  %v1614_v13 = vadd.f32 %v1613_v34, %v1612_v41 }
 0x155   : > { %v1531_v15 = vpop.f32.mrf.mxu1  ;;  %v1607_v31 = vadd.f32 %v1606_v37, %v1605_v57  ;;  %v1634_v48 = vrot.slane %v1633_v42, 1  ;;  %v1641_v6 = vrot.slane %v1640_v39, 1  ;;  %v1682_v21 = vsel %vm1681_vm2, %v2697_v38, %v1600_v12 }
 0x156   : > { %v1654_v11 = vadd.f32 %v1653_v45, %v1652_v16  ;;  %v1664_v46 = vadd.f32 %v1564_v56, %v1548_v44  ;;  %v1660_v27 = vrot.slane %v1659_v5, 2  ;;  %v1565_v30 = vmul.f32 %v1531_v15, %v910_v2 }
 0x157   : > { %v1628_v1 = vadd.f32 %v1627_v50, %v1626_v18  ;;  %v1621_v47 = vadd.f32 %v1620_v58, %v1619_v55  ;;  %v1648_v28 = vrot.slane %v1647_v23, 1  ;;  %v1683_v25 = vsel %vm1681_vm2, %v2704_v32, %v1607_v31  ;;  %v278_v32 = vld [vmem:[%s251_s13] sm:$0x3] }
 0x158   : > { %v1665_v59 = vrot.slane %v1664_v46, 4  ;;  %v1661_v60 = vadd.f32 %v1660_v27, %v1659_v5  ;;  %v1671_v51 = vadd.f32 %v1565_v30, %v1549_v52  ;;  %v1655_v62 = vrot.slane %v1654_v11, 1 }
 0x159   : > { %v1635_v61 = vadd.f32 %v1634_v48, %v1633_v42  ;;  %v1642_v14 = vadd.f32 %v1641_v6, %v1640_v39  ;;  %v1685_v38 = vsel %vm1684_vm3, %v1682_v21, %v1614_v13  ;;  %v1649_v3 = vadd.f32 %v1648_v28, %v1647_v23 }
 0x15a   : > { %v1666_v54 = vadd.f32 %v1665_v59, %v1664_v46  ;;  %v1672_v29 = vrot.slane %v1671_v51, 4  ;;  %v1662_v33 = vrot.slane %v1661_v60, 1  ;;  %v1656_v9 = vadd.f32 %v1655_v62, %v1654_v11 }
 0x15b   : > { %v1688_v0 = vsel %vm1687_vm4, %v1685_v38, %v1628_v1  ;;  %v1686_v57 = vsel %vm1684_vm3, %v1683_v25, %v1621_v47  ;;  %v1706_v63 = vsub.s32 1, %v2176_v8  ;;  %v1703_v55 = vrot.slane %v278_v32, %v2219_v22 }
 0x15c   : > { %v1667_v36 = vrot.slane %v1666_v54, 2  ;;  %v1673_v7 = vadd.f32 %v1672_v29, %v1671_v51  ;;  %v1663_v4 = vadd.f32 %v1662_v33, %v1661_v60  ;;  %v1689_v35 = vsel %vm1687_vm4, %v1686_v57, %v1635_v61 }
 0x15d   : > { %v1691_v17 = vsel %vm1690_vm5, %v1688_v0, %v1642_v14  ;;  %v1692_v20 = vsel %vm1690_vm5, %v1689_v35, %v1649_v3  ;;  %v1707_v12 = vrot.slane %v278_v32, %v1706_v63 }
 0x15e   : > { %v1668_v40 = vadd.f32 %v1667_v36, %v1666_v54  ;;  %v1674_v41 = vrot.slane %v1673_v7, 2  ;;  %v1694_v53 = vsel %vm1693_vm6, %v1691_v17, %v1656_v9  ;;  %v1695_v26 = vsel %vm1693_vm6, %v1692_v20, %v1663_v4 }
 0x160   : > { %v1669_v49 = vrot.slane %v1668_v40, 1  ;;  %v1675_v10 = vadd.f32 %v1674_v41, %v1673_v7 }
 0x162   : > { %v1676_v18 = vrot.slane %v1675_v10, 1  ;;  %v1670_v19 = vadd.f32 %v1669_v49, %v1668_v40 }
 0x164   : > { %v1677_v16 = vadd.f32 %v1676_v18, %v1675_v10  ;;  %v1697_v24 = vsel %vm1696_vm7, %v1694_v53, %v1670_v19 }
 0x165   : > { %v1710_v8 = vsub.f32 %v1697_v24, %v1703_v55 }
 0x166   : > { %v1698_v2 = vsel %vm1696_vm7, %v1695_v26, %v1677_v16 }
 0x167   : > { %v1711_v34 = vsub.f32 %v1698_v2, %v1707_v12  ;;  %v1712_v37 = vand.u32 2147483647, %v1710_v8 }
 0x169   : > { %v1713_v39 = vand.u32 2147483647, %v1711_v34 }
 0x16b   : > { %v1714_v42 = vadd.f32 %v1713_v39, %v1712_v37 }
 0x16d   : > { %1715 = vadd.xlane.f32.xlu0 %v1714_v42 }
 0x1f6   : > { %v1716_v22 = vpop.xlane.xlu0 %1715 }
 0x1f7   : > { %v1717_v43 = vmul.f32 -0.00390625, %v1716_v22 }
 0x1f9   : > { %1719 = vst.msk [vmem:[%s255_s25] sm:$0xff] %vm1718_vm8, %v1717_v43 }
 0x1fa PF: > { %p16_p6 = scmp.ge.s32.totalorder %s2063_s20, 4   ;;  %s2802_s15 = smov %s2000_s16 }
 0x1fb   : > { %s2803_s16 = smov %s2004_s17  ;;  %s2804_s17 = smov %s2073_s23 }
 0x1fc   : > { %s2805_s18 = smov %s2063_s20  ;;  %18 = sbr.rel (!%p16_p6) target bundleno = 5 (0x5), region = 88 }
 0x201   :  { %1739 = vsyncpa [#allocation3], 1 }
 0x202   :  { %1741 = vsyncpa [#allocation3 + $0x1], 1 }
 0x203   :  { %1742 = vsyncpa [#allocation4], 1 }
 0x204   :  { %1744 = vsyncpa [#allocation4 + $0x1], 1 }
 0x205   :  { %1745 = vsyncpa [#allocation6], 1 }

</bundles_post_ra>
